<compile_context>
chip_gen: v5e
topology: v5e:2x2
jax: 0.10.0
libtpu: 0.0.40
codegen_flags: <defaults>
</compile_context>

<pallas_src>
import functools

import jax
import jax.numpy as jnp
from jax import lax
from jax.experimental import pallas as pl
from jax.experimental.pallas import tpu as pltpu


def _round_up(x, m):
    return ((x + m - 1) // m) * m


def _cdiv(a, b):
    return (a + b - 1) // b


def _corr_kernel(a_ref, b_ref, o_ref, *, precision):
    # a_ref: (1, TJ, Cp)  rows = A' columns (in (w, h) order), channel last
    # b_ref: (1, Cp, TI)  B columns (in (h, w) order); TI == S when resident
    # o_ref: (1, TJ, TI)
    acc = lax.dot_general(
        a_ref[0], b_ref[0],
        dimension_numbers=(((1,), (0,)), ((), ())),   # plain matmul on the MXU
        precision=precision,
        preferred_element_type=jnp.float32,
    )
    o_ref[0] = acc.astype(o_ref.dtype)


@functools.partial(
    jax.jit,
    static_argnames=("row_tile", "precision", "vmem_budget_bytes"),
)
def feature_correlation(feature_A, feature_B, *, row_tile=256,
                        precision=lax.Precision.HIGHEST,
                        vmem_budget_bytes=40 * 1024 * 1024):
    """feature_A, feature_B: (B, C, H, W).  Returns (B, H*W, H, W)."""
    b, c, h, w = feature_A.shape
    s = h * w
    out_dtype = jnp.promote_types(feature_A.dtype, feature_B.dtype)
    in_itemsize = jnp.dtype(out_dtype).itemsize
    out_itemsize = in_itemsize

    # A'^T laid out as (b, s, c): row j = A column j in (w, h) order, channel
    # last so the kernel's LHS contraction is over its minor dim (no XLU
    # transpose inside the kernel).  One wrapper-side transpose pass over A.
    a_mat = jnp.transpose(feature_A.astype(out_dtype), (0, 3, 2, 1)).reshape(b, s, c)
    # B as (b, c, s) with columns in (h, w) order -- a free reshape.
    b_mat = feature_B.astype(out_dtype).reshape(b, c, s)

    # Dtype-aware channel (contraction) padding: 8 sublanes for 4-byte, 16 for
    # 2-byte, 32 for 1-byte elements.  Zero padding is exact for a matmul.
    c_p = _round_up(c, 32 // in_itemsize)
    if c_p != c:
        a_mat = jnp.pad(a_mat, ((0, 0), (0, 0), (0, c_p - c)))
        b_mat = jnp.pad(b_mat, ((0, 0), (0, c_p - c), (0, 0)))

    # ---- Row (output-stripe) tile ------------------------------------------
    tj = row_tile
    if b == 1:
        # Keep >= 2 row blocks so v7x's second TensorCore has parallel work.
        tj = min(tj, _cdiv(s, 2))
    if tj < s:
        tj = max(8, _round_up(tj, 8))      # sublane-legal partial tiles
    if tj >= s:
        tj = s                              # block dim == full dim is legal
    num_jt = _cdiv(s, tj)

    # ---- Column tile: resident-B if it fits, else asymmetric tiling --------
    def vmem_bytes(ti_):
        # double-buffered A tile + B block + output stripe
        return (2 * in_itemsize * tj * c_p
                + 2 * in_itemsize * c_p * ti_
                + 2 * out_itemsize * tj * ti_)

    if vmem_bytes(s) <= vmem_budget_bytes:
        ti = s                              # B resident per batch
    else:
        fixed = 2 * in_itemsize * tj * c_p
        per_col = 2 * (in_itemsize * c_p + out_itemsize * tj)
        ti = max(256, ((vmem_budget_bytes - fixed) // per_col) // 256 * 256)
        if ti >= s:
            ti = s
    num_it = _cdiv(s, ti)

    grid = (b, num_jt, num_it)

    vmem_limit = int(min(max(vmem_bytes(ti) + (8 << 20), 32 << 20), 64 << 20))

    cost = pl.CostEstimate(
        flops=2 * b * s * s * c_p,
        transcendentals=0,
        bytes_accessed=(a_mat.size + b_mat.size) * in_itemsize
                       + b * s * s * out_itemsize,
    )

    corr = pl.pallas_call(
        functools.partial(_corr_kernel, precision=precision),
        out_shape=jax.ShapeDtypeStruct((b, s, s), out_dtype),
        grid_spec=pltpu.PrefetchScalarGridSpec(
            num_scalar_prefetch=0,
            grid=grid,
            in_specs=[
                # A row tile: re-used across the (usually singleton) it axis.
                pl.BlockSpec((1, tj, c_p), lambda bi, jt, it: (bi, jt, 0)),
                # B block: full spatial width when resident (index constant
                # per batch -> one DMA per batch), otherwise 256-multiple tiles.
                pl.BlockSpec((1, c_p, ti), lambda bi, jt, it: (bi, 0, it)),
            ],
            out_specs=pl.BlockSpec((1, tj, ti),
                                   lambda bi, jt, it: (bi, jt, it)),
        ),
        compiler_params=pltpu.CompilerParams(
            # Every output block is written exactly once -> all axes parallel
            # (lets v7x shard blocks across both TensorCores).
            dimension_semantics=("parallel", "parallel", "parallel"),
            vmem_limit_bytes=vmem_limit,
        ),
        cost_estimate=cost,
    )(a_mat, b_mat)

    # (b, S_A, S_B) -> (b, h*w, h, w); already in the final channel order,
    # no slicing needed (the kernel never pads the output's spatial axes).
    return corr.reshape(b, s, h, w)


if __name__ == "__main__":
    key = jax.random.PRNGKey(0)
    ka, kb = jax.random.split(key)
    B, C, H, W = 2, 4, 16, 16
    feature_A = jax.random.normal(ka, (B, C, H, W), dtype=jnp.float32)
    feature_B = jax.random.normal(kb, (B, C, H, W), dtype=jnp.float32)
    # Round inputs to bf16-representable values so the numerical check is
    # insensitive to the MXU contraction-precision path.
    feature_A = feature_A.astype(jnp.bfloat16).astype(jnp.float32)
    feature_B = feature_B.astype(jnp.bfloat16).astype(jnp.float32)

    out = jax.block_until_ready(feature_correlation(feature_A, feature_B))

    # Pure-JAX reference mirroring the PyTorch forward (numpy f32 matmul).
    S = H * W
    fa = jnp.transpose(feature_A, (0, 1, 3, 2)).reshape(B, C, S)
    fb = jnp.transpose(feature_B.reshape(B, C, S), (0, 2, 1))
    mul = jnp.einsum("bic,bcj->bij", fb, fa,
                     precision=jax.lax.Precision.HIGHEST)
    ref = jnp.transpose(mul.reshape(B, H, W, S), (0, 3, 1, 2))

    assert out.shape == (B, S, H, W), out.shape
    assert out.dtype == ref.dtype, (out.dtype, ref.dtype)
    assert jnp.allclose(out, ref, atol=1e-4, rtol=1e-4)

    print("KERNEL_OK")
</pallas_src>

<mosaic_0001>
module attributes {stable_mosaic.version = 11 : i64} {
  func.func @_corr_kernel(%arg0: i32, %arg1: i32, %arg2: i32, %arg3: memref<1x256x8xf32, #tpu.memory_space<vmem>>, %arg4: memref<1x8x256xf32, #tpu.memory_space<vmem>>, %arg5: memref<1x256x256xf32, #tpu.memory_space<vmem>>) attributes {dimension_semantics = [#tpu.dimension_semantics<parallel>, #tpu.dimension_semantics<parallel>, #tpu.dimension_semantics<parallel>], iteration_bounds = array<i64: 2, 1, 1>, scalar_prefetch = 0 : i64, scratch_operands = 0 : i64, tpu.core_type = #tpu.core_type<tc>, window_params = [{transform_indices = @transform_0, window_bounds = array<i64: 1, 256, 8>}, {transform_indices = @transform_1, window_bounds = array<i64: 1, 8, 256>}, {transform_indices = @transform_2, window_bounds = array<i64: 1, 256, 256>}]} {
    %c0 = arith.constant 0 : index
    %c0_0 = arith.constant 0 : index
    %c0_1 = arith.constant 0 : index
    %0 = vector.load %arg3[%c0, %c0_0, %c0_1] : memref<1x256x8xf32, #tpu.memory_space<vmem>>, vector<1x256x8xf32>
    %1 = vector.shape_cast %0 : vector<1x256x8xf32> to vector<256x8xf32>
    %c0_2 = arith.constant 0 : index
    %c0_3 = arith.constant 0 : index
    %c0_4 = arith.constant 0 : index
    %2 = vector.load %arg4[%c0_2, %c0_3, %c0_4] : memref<1x8x256xf32, #tpu.memory_space<vmem>>, vector<1x8x256xf32>
    %3 = vector.shape_cast %2 : vector<1x8x256xf32> to vector<8x256xf32>
    %cst = arith.constant dense<0.000000e+00> : vector<256x256xf32>
    %4 = tpu.matmul %1, %3, %cst {dimension_numbers = #tpu.dot_dimension_numbers<[1], [0], [0], [1], [0, 0, 1, 1], [], []>, precision = #tpu.contract_precision<fp32>} : vector<256x8xf32>, vector<8x256xf32>, vector<256x256xf32> -> vector<256x256xf32>
    %c0_5 = arith.constant 0 : index
    %c0_6 = arith.constant 0 : index
    %c0_7 = arith.constant 0 : index
    %5 = vector.load %arg5[%c0_5, %c0_6, %c0_7] : memref<1x256x256xf32, #tpu.memory_space<vmem>>, vector<1x256x256xf32>
    %6 = vector.shape_cast %5 : vector<1x256x256xf32> to vector<256x256xf32>
    %7 = vector.shape_cast %4 : vector<256x256xf32> to vector<1x256x256xf32>
    tpu.vector_store %arg5[%c0_5, %c0_6, %c0_7], %7 {strides = array<i32>} : memref<1x256x256xf32, #tpu.memory_space<vmem>>, vector<1x256x256xf32>,
    return
  }
  func.func @transform_0(%arg0: i32, %arg1: i32, %arg2: i32) -> (i32, i32, i32) {
    %c0_i32 = arith.constant 0 : i32
    %c0_i32_0 = arith.constant 0 : i32
    return %arg0, %arg1, %c0_i32 : i32, i32, i32
  }
  func.func @transform_1(%arg0: i32, %arg1: i32, %arg2: i32) -> (i32, i32, i32) {
    %c0_i32 = arith.constant 0 : i32
    %c0_i32_0 = arith.constant 0 : i32
    return %arg0, %c0_i32, %arg2 : i32, i32, i32
  }
  func.func @transform_2(%arg0: i32, %arg1: i32, %arg2: i32) -> (i32, i32, i32) {
    %c0_i32 = arith.constant 0 : i32
    return %arg0, %arg1, %arg2 : i32, i32, i32
  }
}

</mosaic_0001>

<bundles_post_ra>
// kernel: feature_correlation.1
= control target key start
LH: loop header
LB: loop body
LE: loop exit
PB: predicated region body
PF: predicated region fallthrough
CT: control target
= control target key end

     0   :  { %s2854_s9 = smov 0   ;;  %s2856_s10 = smov 0   ;;  %s3987_s0 = inlined_call_operand.vmem [shape: f32[2,256,8], index: 0, kind: input, shape index: {}]   ;;  %s3988_s1 = inlined_call_operand.vmem [shape: f32[2,8,256], index: 1, kind: input, shape index: {}]   ;;  %s3989_s2 = inlined_call_operand.vmem [shape: f32[2,256,256], index: 2, kind: output, shape index: {}]  }
   0x1   :  { %s2858_s11 = smov 0  }
   0x2 LB: > { %s31_s12 = sadd.s32 1, %s2833_s10  ;;  %p2779_p0 = scmp.ge.s32.totalorder %s2837_s11, 1  ;;  %s2837_s11 = sphi %s2858_s11, %s12_s11   ;;  %s2833_s10 = sphi %s2856_s10, %s4294_s10   ;;  %s2829_s9 = sphi %s2854_s9, %s4293_s9  }
   0x3   : > { %p33_p1 = scmp.ge.s32.totalorder %s31_s12, 2  ;;  %p159_p2 = scmp.lt.s32.totalorder %s2837_s11, 3 }
   0x5   : > { %s4296_s12 = smov (%p33_p1, %s31_s12), 0  ;;  %p160_p3 = pnand %p2779_p0, %p159_p2 }
   0x7   : > { %163 = sbr.rel (%p160_p3) target bundleno = 925 (0x39d), region = 28 }
   0xc   : > { %p204_p4 = scmp.lt.s32.totalorder %s2829_s9, 1  ;;  %vm273_vm0 = vcmask 64512  }
   0xe   : > { %s4298_s9 = smov (!%p204_p4, %s2829_s9), 1 }
   0xf   : > { %s2789_s13 = sshll.u32 %s4298_s9, 4  ;;  %s2788_s14 = sshll.u32 %s4298_s9, 8 }
  0x10   : > { %s221_s17 = scalar_lea.vmem %s3988_s1, %s2789_s13  ;;  %s2882_s20 = scalar_lea.vmem %s3987_s0, %s2788_s14 }
  0x11   : > { %v271_v0 = vld [vmem:[%s221_s17] sm:$0xff]  ;;  %v272_v1 = vld [vmem:[%s221_s17 + $0x8] sm:$0xff]  ;;  %v241_v9 = vld [vmem:[%s2882_s20 + $0x10] sm:$0xff]  ;;  %s2790_s21 = sshll.u32 %s4298_s9, 9 }
  0x12   : > { %v239_v2 = vld [vmem:[%s2882_s20] sm:$0xff]  ;;  %v385_v3 = vand.u32 4294901760, %v271_v0  ;;  %v1492_v5 = vand.u32 4294901760, %v272_v1  ;;  %v240_v6 = vld [vmem:[%s2882_s20 + $0x8] sm:$0xff]  ;;  %v281_v17 = vsel %vm273_vm0, %v241_v9, 0  ;;  %v242_v27 = vld [vmem:[%s2882_s20 + $0x18] sm:$0xff]  ;;  %s3595_s24 = scalar_lea.vmem %s3989_s2, %s2790_s21 }
  0x13   : > { %v275_v4 = vsel %vm273_vm0, %v239_v2, 0  ;;  %v278_v8 = vsel %vm273_vm0, %v240_v6, 0  ;;  %v2910_v23 = vand.u32 4294901760, %v281_v17  ;;  %v284_v30 = vsel %vm273_vm0, %v242_v27, 0  ;;  %v243_v34 = vld [vmem:[%s2882_s20 + $0x20] sm:$0xff]  ;;  %v244_v41 = vld [vmem:[%s2882_s20 + $0x28] sm:$0xff] }
  0x14   : > { %v2887_v7 = vand.u32 4294901760, %v275_v4  ;;  %v660_v10 = vsub.f32 %v271_v0, %v385_v3  ;;  %989 = vmatpush.msra.mxu3 %v385_v3  ;;  %386 = vmatpush.msra.mxu0 %v385_v3  ;;  %v1767_v11 = vsub.f32 %v272_v1, %v1492_v5  ;;  %v2891_v12 = vand.u32 4294901760, %v278_v8  ;;  %v245_v48 = vld [vmem:[%s2882_s20 + $0x30] sm:$0xff]  ;;  %v246_v55 = vld [vmem:[%s2882_s20 + $0x38] sm:$0xff]  ;;  %v247_v62 = vld [vmem:[%s2882_s20 + $0x40] sm:$0xff] }
  0x15   : > { %v2920_v29 = vsub.f32 %v281_v17, %v2910_v23  ;;  %v2930_v33 = vand.u32 4294901760, %v284_v30  ;;  %v287_v37 = vsel %vm273_vm0, %v243_v34, 0  ;;  %v290_v44 = vsel %vm273_vm0, %v244_v41, 0  ;;  %v250_v27 = vld [vmem:[%s2882_s20 + $0x58] sm:$0xff] }
  0x16   : > { %v2894_v13 = vsub.f32 %v275_v4, %v2887_v7  ;;  %811 = vmatpush.msra.mxu2 %v660_v10  ;;  %v661_v14 = vand.u32 4294901760, %v660_v10  ;;  %v1768_v15 = vand.u32 4294901760, %v1767_v11  ;;  %v2897_v16 = vsub.f32 %v278_v8, %v2891_v12 }
  0x17   : > { %4093 = vst [vmem:[#allocation6_spill] sm:$0xff] %v2920_v29  ;;  %v2928_v32 = vand.u32 4294901760, %v2920_v29  ;;  %v2938_v36 = vsub.f32 %v284_v30, %v2930_v33  ;;  %v2948_v40 = vand.u32 4294901760, %v287_v37  ;;  %v2966_v47 = vand.u32 4294901760, %v290_v44 }
  0x18   : > { %4089 = vst [vmem:[#allocation2_spill] sm:$0xff] %v2894_v13  ;;  %814 = vmatmul.f32.vlgmr.msra.gmra.mxu2 %v2894_v13  ;;  %v2902_v18 = vand.u32 4294901760, %v2894_v13  ;;  %v662_v19 = vsub.f32 %v660_v10, %v661_v14  ;;  %1201 = vmatpush.msrb.mxu0 %v661_v14  ;;  %v1769_v20 = vsub.f32 %v1767_v11, %v1768_v15  ;;  %v2908_v22 = vand.u32 4294901760, %v2897_v16 }
  0x19   : > { %4090 = vst [vmem:[#allocation3_spill] sm:$0xff] %v2897_v16  ;;  %1493 = vmatpush.msrb.mxu2 %v1492_v5  ;;  %v406_v35 = vsub.f32 %v2920_v29, %v2928_v32  ;;  %v2946_v39 = vand.u32 4294901760, %v2938_v36  ;;  %v2956_v43 = vsub.f32 %v287_v37, %v2948_v40  ;;  %v2974_v50 = vsub.f32 %v290_v44, %v2966_v47 }
  0x1a   : > { %4091 = vst [vmem:[#allocation4_spill] sm:$0xff] %v2902_v18  ;;  %993 = vmatmul.f32.vlgmr.msra.gmra.mxu3 %v2902_v18  ;;  %v390_v21 = vsub.f32 %v2894_v13, %v2902_v18  ;;  %v663_v24 = vand.u32 4294901760, %v662_v19  ;;  %v1770_v25 = vand.u32 4294901760, %v1769_v20  ;;  %v398_v28 = vsub.f32 %v2897_v16, %v2908_v22 }
  0x1b   : > { %4092 = vst [vmem:[#allocation5_spill] sm:$0xff] %v2908_v22  ;;  %2308 = vmatpush.msra.mxu2 %v1768_v15  ;;  %v2943_v38 = vand.u32 4294901760, %v406_v35  ;;  %v414_v42 = vsub.f32 %v2938_v36, %v2946_v39  ;;  %v2964_v46 = vand.u32 4294901760, %v2956_v43  ;;  %v293_v51 = vsel %vm273_vm0, %v245_v48, 0  ;;  %v249_v15 = vld [vmem:[%s2882_s20 + $0x50] sm:$0xff] }
  0x1c   : > { %v2912_v26 = vand.u32 4294901760, %v390_v21  ;;  %664 = vmatpush.msra.mxu1 %v663_v24  ;;  %1771 = vmatpush.msrb.mxu3 %v1770_v25  ;;  %v2925_v31 = vand.u32 4294901760, %v398_v28  ;;  %4094 = vst [vmem:[#allocation7_spill] sm:$0xff] %v2928_v32  ;;  %v2982_v53 = vand.u32 4294901760, %v2974_v50  ;;  %v2984_v54 = vand.u32 4294901760, %v293_v51 }
  0x1d   : > { %666 = vmatmul.f32.vlgmr.msra.gmra.mxu1 %v2887_v7  ;;  %4095 = vst [vmem:[#allocation8_spill] sm:$0xff] %v2938_v36  ;;  %v2961_v45 = vand.u32 4294901760, %v414_v42  ;;  %v422_v49 = vsub.f32 %v2956_v43, %v2964_v46  ;;  %v296_v58 = vsel %vm273_vm0, %v246_v55, 0  ;;  %v299_v1 = vsel %vm273_vm0, %v247_v62, 0  ;;  %v251_v42 = vld [vmem:[%s2882_s20 + $0x60] sm:$0xff] }
  0x1e   : > { %392 = vmatmul.f32.vlgmr.msra.gmra.mxu0 %v2912_v26  ;;  %1347 = vmatpush.msrb.mxu1 %v385_v3  ;;  %4096 = vst [vmem:[#allocation9_spill] sm:$0xff] %v2946_v39  ;;  %v430_v56 = vsub.f32 %v2974_v50, %v2982_v53  ;;  %v2992_v57 = vsub.f32 %v293_v51, %v2984_v54  ;;  %v3002_v61 = vand.u32 4294901760, %v296_v58  ;;  %v3020_v4 = vand.u32 4294901760, %v299_v1 }
  0x1f   : > { %1918 = vmatpush.msra.mxu0 %v1767_v11  ;;  %2454 = vmatpush.msra.mxu3 %v1492_v5  ;;  %4097 = vst [vmem:[#allocation10_spill] sm:$0xff] %v2956_v43  ;;  %v2979_v52 = vand.u32 4294901760, %v422_v49  ;;  %v305_v20 = vsel %vm273_vm0, %v249_v15, 0  ;;  %v308_v34 = vsel %vm273_vm0, %v250_v27, 0  ;;  %v311_v49 = vsel %vm273_vm0, %v251_v42, 0  ;;  %v253_v15 = vld [vmem:[%s2882_s20 + $0x70] sm:$0xff] }
  0x20   : > { %819 = vmatmul.f32.gmra.mxu2 %v2897_v16  ;;  %2096 = vmatpush.msra.mxu1 %v1492_v5  ;;  %4098 = vst [vmem:[#allocation11_spill] sm:$0xff] %v2964_v46  ;;  %v2997_v59 = vand.u32 4294901760, %v430_v56  ;;  %v3000_v60 = vand.u32 4294901760, %v2992_v57  ;;  %v3010_v0 = vsub.f32 %v296_v58, %v3002_v61  ;;  %v248_v5 = vld [vmem:[%s2882_s20 + $0x48] sm:$0xff]  ;;  %v3028_v8 = vsub.f32 %v299_v1, %v3020_v4  ;;  %v262_v16 = vld [vmem:[%s2882_s20 + $0xb8] sm:$0xff] }
  0x21   : > { %4099 = vst [vmem:[#allocation12_spill] sm:$0xff] %v2974_v50  ;;  %v302_v9 = vsel %vm273_vm0, %v248_v5, 0  ;;  %v3056_v25 = vand.u32 4294901760, %v305_v20  ;;  %v3074_v41 = vand.u32 4294901760, %v308_v34  ;;  %v3092_v56 = vand.u32 4294901760, %v311_v49  ;;  %v252_v58 = vld [vmem:[%s2882_s20 + $0x68] sm:$0xff] }
  0x22   : > { %999 = vmatmul.f32.gmra.mxu3 %v2908_v22  ;;  %4100 = vst [vmem:[#allocation13_spill] sm:$0xff] %v2982_v53  ;;  %v438_v63 = vsub.f32 %v2992_v57, %v3000_v60  ;;  %v3018_v3 = vand.u32 4294901760, %v3010_v0  ;;  %v3036_v11 = vand.u32 4294901760, %v3028_v8  ;;  %v3038_v14 = vand.u32 4294901760, %v302_v9 }
  0x23   : > { %4101 = vst [vmem:[#allocation14_spill] sm:$0xff] %v2992_v57  ;;  %v3064_v30 = vsub.f32 %v305_v20, %v3056_v25  ;;  %v3082_v48 = vsub.f32 %v308_v34, %v3074_v41  ;;  %v314_v1 = vsel %vm273_vm0, %v252_v58, 0  ;;  %v317_v27 = vsel %vm273_vm0, %v253_v15, 0 }
  0x24   : > { %4102 = vst [vmem:[#allocation15_spill] sm:$0xff] %v3000_v60  ;;  %v3015_v2 = vand.u32 4294901760, %v438_v63  ;;  %v446_v6 = vsub.f32 %v3010_v0, %v3018_v3  ;;  %v454_v17 = vsub.f32 %v3028_v8, %v3036_v11  ;;  %v3046_v19 = vsub.f32 %v302_v9, %v3038_v14 }
  0x25   : > { %670 = vmatmul.f32.gmra.mxu1 %v2891_v12  ;;  %4103 = vst [vmem:[#allocation16_spill] sm:$0xff] %v3010_v0  ;;  %v3072_v37 = vand.u32 4294901760, %v3064_v30  ;;  %v3090_v55 = vand.u32 4294901760, %v3082_v48  ;;  %v3100_v63 = vsub.f32 %v311_v49, %v3092_v56  ;;  %v3110_v9 = vand.u32 4294901760, %v314_v1 }
  0x26   : > { %400 = vmatmul.f32.gmra.mxu0 %v2925_v31  ;;  %4104 = vst [vmem:[#allocation17_spill] sm:$0xff] %v3018_v3  ;;  %v3033_v10 = vand.u32 4294901760, %v446_v6  ;;  %v3051_v21 = vand.u32 4294901760, %v454_v17  ;;  %v3054_v24 = vand.u32 4294901760, %v3046_v19  ;;  %v3128_v42 = vand.u32 4294901760, %v317_v27 }
  0x27   : > { %4105 = vst [vmem:[#allocation18_spill] sm:$0xff] %v3028_v8  ;;  %v470_v44 = vsub.f32 %v3064_v30, %v3072_v37  ;;  %v478_v62 = vsub.f32 %v3082_v48, %v3090_v55  ;;  %v3108_v6 = vand.u32 4294901760, %v3100_v63  ;;  %v3118_v20 = vsub.f32 %v314_v1, %v3110_v9 }
  0x28   : > { %824 = vmatmul.f32.gmra.mxu2 %v2920_v29  ;;  %4106 = vst [vmem:[#allocation19_spill] sm:$0xff] %v3036_v11  ;;  %v462_v28 = vsub.f32 %v3046_v19, %v3054_v24  ;;  %v3136_v58 = vsub.f32 %v317_v27, %v3128_v42 }
  0x29   : > { %4107 = vst [vmem:[#allocation20_spill] sm:$0xff] %v3046_v19  ;;  %v3087_v51 = vand.u32 4294901760, %v470_v44  ;;  %v3105_v5 = vand.u32 4294901760, %v478_v62  ;;  %v486_v17 = vsub.f32 %v3100_v63, %v3108_v6  ;;  %v3126_v34 = vand.u32 4294901760, %v3118_v20  ;;  %v254_v44 = vld [vmem:[%s2882_s20 + $0x78] sm:$0xff] }
  0x2a   : > { %1005 = vmatmul.f32.gmra.mxu3 %v2928_v32  ;;  %4108 = vst [vmem:[#allocation21_spill] sm:$0xff] %v3054_v24  ;;  %v3069_v35 = vand.u32 4294901760, %v462_v28  ;;  %v320_v62 = vsel %vm273_vm0, %v254_v44, 0  ;;  %v3144_v15 = vand.u32 4294901760, %v3136_v58  ;;  %v261_v32 = vld [vmem:[%s2882_s20 + $0xb0] sm:$0xff] }
  0x2b   : > { %4109 = vst [vmem:[#allocation22_spill] sm:$0xff] %v3064_v30  ;;  %v3123_v28 = vand.u32 4294901760, %v486_v17  ;;  %v494_v49 = vsub.f32 %v3118_v20, %v3126_v34  ;;  %v3146_v17 = vand.u32 4294901760, %v320_v62 }
  0x2c   : > { %4110 = vst [vmem:[#allocation23_spill] sm:$0xff] %v3072_v37  ;;  %v502_v27 = vsub.f32 %v3136_v58, %v3144_v15 }
  0x2d   : > { %674 = vmatmul.f32.gmra.mxu1 %v2910_v23  ;;  %4111 = vst [vmem:[#allocation24_spill] sm:$0xff] %v3082_v48  ;;  %v3141_v1 = vand.u32 4294901760, %v494_v49  ;;  %v3154_v44 = vsub.f32 %v320_v62, %v3146_v17 }
  0x2e   : > { %408 = vmatmul.f32.gmra.mxu0 %v2943_v38  ;;  %4112 = vst [vmem:[#allocation25_spill] sm:$0xff] %v3090_v55  ;;  %v3159_v49 = vand.u32 4294901760, %v502_v27 }
  0x2f   : > { %4113 = vst [vmem:[#allocation26_spill] sm:$0xff] %v3100_v63 }
  0x30   : > { %829 = vmatmul.f32.gmra.mxu2 %v2938_v36  ;;  %4114 = vst [vmem:[#allocation27_spill] sm:$0xff] %v3108_v6 }
  0x31   : > { %4115 = vst [vmem:[#allocation28_spill] sm:$0xff] %v3118_v20 }
  0x32   : > { %1011 = vmatmul.f32.gmra.mxu3 %v2946_v39  ;;  %4116 = vst [vmem:[#allocation29_spill] sm:$0xff] %v3126_v34 }
  0x33   : > { %4117 = vst [vmem:[#allocation30_spill] sm:$0xff] %v3136_v58 }
  0x34   : > { %4118 = vst [vmem:[#allocation31_spill] sm:$0xff] %v3144_v15 }
  0x35   : > { %678 = vmatmul.f32.gmra.mxu1 %v2930_v33  ;;  %4119 = vst [vmem:[#allocation32_spill] sm:$0xff] %v3154_v44 }
  0x36   : > { %416 = vmatmul.f32.gmra.mxu0 %v2961_v45 }
  0x38   : > { %834 = vmatmul.f32.gmra.mxu2 %v2956_v43  ;;  %v260_v43 = vld [vmem:[%s2882_s20 + $0xa8] sm:$0xff] }
  0x3a   : > { %1017 = vmatmul.f32.gmra.mxu3 %v2964_v46 }
  0x3d   : > { %682 = vmatmul.f32.gmra.mxu1 %v2948_v40 }
  0x3e   : > { %424 = vmatmul.f32.gmra.mxu0 %v2979_v52 }
  0x40   : > { %839 = vmatmul.f32.gmra.mxu2 %v2974_v50 }
  0x42   : > { %1023 = vmatmul.f32.gmra.mxu3 %v2982_v53  ;;  %v259_v53 = vld [vmem:[%s2882_s20 + $0xa0] sm:$0xff] }
  0x45   : > { %686 = vmatmul.f32.gmra.mxu1 %v2966_v47 }
  0x46   : > { %432 = vmatmul.f32.gmra.mxu0 %v2997_v59 }
  0x48   : > { %844 = vmatmul.f32.gmra.mxu2 %v2992_v57 }
  0x4a   : > { %1029 = vmatmul.f32.gmra.mxu3 %v3000_v60 }
  0x4d   : > { %690 = vmatmul.f32.gmra.mxu1 %v2984_v54 }
  0x4e   : > { %440 = vmatmul.f32.gmra.mxu0 %v3015_v2 }
  0x50   : > { %849 = vmatmul.f32.gmra.mxu2 %v3010_v0 }
  0x52   : > { %1035 = vmatmul.f32.gmra.mxu3 %v3018_v3  ;;  %v258_v3 = vld [vmem:[%s2882_s20 + $0x98] sm:$0xff] }
  0x55   : > { %694 = vmatmul.f32.gmra.mxu1 %v3002_v61 }
  0x56   : > { %448 = vmatmul.f32.gmra.mxu0 %v3033_v10 }
  0x58   : > { %854 = vmatmul.f32.gmra.mxu2 %v3028_v8 }
  0x5a   : > { %1041 = vmatmul.f32.gmra.mxu3 %v3036_v11 }
  0x5d   : > { %698 = vmatmul.f32.gmra.mxu1 %v3020_v4 }
  0x5e   : > { %456 = vmatmul.f32.gmra.mxu0 %v3051_v21 }
  0x60   : > { %859 = vmatmul.f32.gmra.mxu2 %v3046_v19 }
  0x62   : > { %1047 = vmatmul.f32.gmra.mxu3 %v3054_v24 }
  0x65   : > { %702 = vmatmul.f32.gmra.mxu1 %v3038_v14 }
  0x66   : > { %464 = vmatmul.f32.gmra.mxu0 %v3069_v35 }
  0x68   : > { %864 = vmatmul.f32.gmra.mxu2 %v3064_v30 }
  0x6a   : > { %1053 = vmatmul.f32.gmra.mxu3 %v3072_v37  ;;  %v257_v37 = vld [vmem:[%s2882_s20 + $0x90] sm:$0xff] }
  0x6d   : > { %706 = vmatmul.f32.gmra.mxu1 %v3056_v25 }
  0x6e   : > { %472 = vmatmul.f32.gmra.mxu0 %v3087_v51 }
  0x70   : > { %869 = vmatmul.f32.gmra.mxu2 %v3082_v48 }
  0x72   : > { %1059 = vmatmul.f32.gmra.mxu3 %v3090_v55  ;;  %v256_v55 = vld [vmem:[%s2882_s20 + $0x88] sm:$0xff] }
  0x75   : > { %710 = vmatmul.f32.gmra.mxu1 %v3074_v41 }
  0x76   : > { %480 = vmatmul.f32.gmra.mxu0 %v3105_v5 }
  0x78   : > { %874 = vmatmul.f32.gmra.mxu2 %v3100_v63 }
  0x7a   : > { %1065 = vmatmul.f32.gmra.mxu3 %v3108_v6  ;;  %v255_v6 = vld [vmem:[%s2882_s20 + $0x80] sm:$0xff] }
  0x7d   : > { %714 = vmatmul.f32.gmra.mxu1 %v3092_v56 }
  0x7e   : > { %488 = vmatmul.f32.gmra.mxu0 %v3123_v28 }
  0x80   : > { %879 = vmatmul.f32.gmra.mxu2 %v3118_v20  ;;  %v3162_v20 = vand.u32 4294901760, %v3154_v44 }
  0x82   : > { %1071 = vmatmul.f32.gmra.mxu3 %v3126_v34  ;;  %v323_v34 = vsel %vm273_vm0, %v255_v6, 0  ;;  %4120 = vst [vmem:[#allocation33_spill] sm:$0xff] %v3162_v20  ;;  %v510_v6 = vsub.f32 %v3154_v44, %v3162_v20 }
  0x83   : > { %v3164_v63 = vand.u32 4294901760, %v323_v34 }
  0x84   : > { %v3177_v27 = vand.u32 4294901760, %v510_v6  ;;  %v329_v6 = vsel %vm273_vm0, %v257_v37, 0 }
  0x85   : > { %718 = vmatmul.f32.gmra.mxu1 %v3110_v9  ;;  %v3172_v62 = vsub.f32 %v323_v34, %v3164_v63  ;;  %v3200_v30 = vand.u32 4294901760, %v329_v6 }
  0x86   : > { %496 = vmatmul.f32.gmra.mxu0 %v3141_v1 }
  0x87   : > { %4121 = vst [vmem:[#allocation34_spill] sm:$0xff] %v3172_v62 }
  0x88   : > { %884 = vmatmul.f32.gmra.mxu2 %v3136_v58  ;;  %v3180_v58 = vand.u32 4294901760, %v3172_v62 }
  0x8a   : > { %1077 = vmatmul.f32.gmra.mxu3 %v3144_v15  ;;  %v326_v15 = vsel %vm273_vm0, %v256_v55, 0  ;;  %4122 = vst [vmem:[#allocation35_spill] sm:$0xff] %v3180_v58  ;;  %v518_v55 = vsub.f32 %v3172_v62, %v3180_v58 }
  0x8b   : > { %v3182_v48 = vand.u32 4294901760, %v326_v15 }
  0x8d   : > { %722 = vmatmul.f32.gmra.mxu1 %v3128_v42  ;;  %v3190_v34 = vsub.f32 %v326_v15, %v3182_v48 }
  0x8e   : > { %504 = vmatmul.f32.gmra.mxu0 %v3159_v49 }
  0x8f   : > { %4123 = vst [vmem:[#allocation36_spill] sm:$0xff] %v3190_v34 }
  0x90   : > { %889 = vmatmul.f32.gmra.mxu2 %v3154_v44  ;;  %v3198_v44 = vand.u32 4294901760, %v3190_v34 }
  0x92   : > { %1083 = vmatmul.f32.gmra.mxu3 %v3162_v20  ;;  %v3195_v20 = vand.u32 4294901760, %v518_v55  ;;  %4124 = vst [vmem:[#allocation37_spill] sm:$0xff] %v3198_v44  ;;  %v526_v37 = vsub.f32 %v3190_v34, %v3198_v44  ;;  %v3208_v55 = vsub.f32 %v329_v6, %v3200_v30 }
  0x94   : > { %4125 = vst [vmem:[#allocation38_spill] sm:$0xff] %v3208_v55 }
  0x95   : > { %726 = vmatmul.f32.gmra.mxu1 %v3146_v17 }
  0x96   : > { %512 = vmatmul.f32.gmra.mxu0 %v3177_v27 }
  0x98   : > { %894 = vmatmul.f32.gmra.mxu2 %v3172_v62 }
  0x9a   : > { %1089 = vmatmul.f32.gmra.mxu3 %v3180_v58  ;;  %v667_v19 = vpop.f32.mrf.mxu1  ;;  %v332_v58 = vsel %vm273_vm0, %v258_v3, 0 }
  0x9b   : > { %v393_v24 = vpop.f32.mrf.mxu0  ;;  %v815_v8 = vpop.f32.mrf.mxu2 }
  0x9c   : > { %v668_v11 = vadd.f32 %v667_v19, %v393_v24  ;;  %v3220_v19 = vand.u32 4294901760, %v332_v58 }
  0x9d   : > { %v994_v15 = vpop.f32.mrf.mxu3  ;;  %730 = vmatmul.f32.gmra.mxu1 %v3164_v63 }
  0x9e   : > { %v816_v0 = vadd.f32 %v815_v8, %v668_v11  ;;  %520 = vmatmul.f32.gmra.mxu0 %v3195_v20  ;;  %v3215_v8 = vand.u32 4294901760, %v526_v37  ;;  %v3218_v11 = vand.u32 4294901760, %v3208_v55  ;;  %v335_v37 = vsel %vm273_vm0, %v259_v53, 0 }
  0xa0   : > { %v3211_v62 = vadd.f32 %v994_v15, %v816_v0  ;;  %899 = vmatmul.f32.gmra.mxu2 %v3190_v34  ;;  %4126 = vst [vmem:[#allocation39_spill] sm:$0xff] %v3218_v11  ;;  %v534_v0 = vsub.f32 %v3208_v55, %v3218_v11  ;;  %v3228_v15 = vsub.f32 %v332_v58, %v3220_v19 }
  0xa2   : > { %1095 = vmatmul.f32.gmra.mxu3 %v3198_v44  ;;  %v671_v60 = vpop.f32.mrf.mxu1  ;;  %4127 = vst [vmem:[#allocation40_spill] sm:$0xff] %v3228_v15 }
  0xa3   : > { %v401_v24 = vpop.f32.mrf.mxu0  ;;  %v820_v6 = vpop.f32.mrf.mxu2 }
  0xa4   : > { %v672_v57 = vadd.f32 %v671_v60, %v401_v24  ;;  %v3238_v60 = vand.u32 4294901760, %v3228_v15  ;;  %v3240_v24 = vand.u32 4294901760, %v335_v37 }
  0xa5   : > { %v1000_v50 = vpop.f32.mrf.mxu3  ;;  %734 = vmatmul.f32.gmra.mxu1 %v3182_v48 }
  0xa6   : > { %v821_v3 = vadd.f32 %v820_v6, %v672_v57  ;;  %528 = vmatmul.f32.gmra.mxu0 %v3215_v8  ;;  %v3235_v57 = vand.u32 4294901760, %v534_v0  ;;  %4128 = vst [vmem:[#allocation41_spill] sm:$0xff] %v3238_v60  ;;  %v338_v0 = vsel %vm273_vm0, %v260_v43, 0 }
  0xa7   : > { %4129 = vst [vmem:[#allocation42_spill] sm:$0xff] %v3240_v24 }
  0xa8   : > { %v3231_v44 = vadd.f32 %v1000_v50, %v821_v3  ;;  %904 = vmatmul.f32.gmra.mxu2 %v3208_v55  ;;  %v542_v50 = vsub.f32 %v3228_v15, %v3238_v60  ;;  %v3248_v3 = vsub.f32 %v335_v37, %v3240_v24 }
  0xaa   : > { %1101 = vmatmul.f32.gmra.mxu3 %v3218_v11  ;;  %v675_v34 = vpop.f32.mrf.mxu1  ;;  %4130 = vst [vmem:[#allocation43_spill] sm:$0xff] %v3248_v3 }
  0xab   : > { %v409_v6 = vpop.f32.mrf.mxu0  ;;  %v825_v58 = vpop.f32.mrf.mxu2 }
  0xac   : > { %v676_v46 = vadd.f32 %v675_v34, %v409_v6  ;;  %v3258_v34 = vand.u32 4294901760, %v3248_v3  ;;  %v3260_v6 = vand.u32 4294901760, %v338_v0 }
  0xad   : > { %v1006_v39 = vpop.f32.mrf.mxu3  ;;  %738 = vmatmul.f32.gmra.mxu1 %v3200_v30 }
  0xae   : > { %v826_v53 = vadd.f32 %v825_v58, %v676_v46  ;;  %536 = vmatmul.f32.gmra.mxu0 %v3235_v57  ;;  %v3255_v46 = vand.u32 4294901760, %v542_v50  ;;  %4131 = vst [vmem:[#allocation44_spill] sm:$0xff] %v3258_v34  ;;  %v341_v50 = vsel %vm273_vm0, %v261_v32, 0 }
  0xaf   : > { %4132 = vst [vmem:[#allocation45_spill] sm:$0xff] %v3260_v6 }
  0xb0   : > { %v3251_v11 = vadd.f32 %v1006_v39, %v826_v53  ;;  %909 = vmatmul.f32.gmra.mxu2 %v3228_v15  ;;  %v550_v39 = vsub.f32 %v3248_v3, %v3258_v34  ;;  %v3268_v53 = vsub.f32 %v338_v0, %v3260_v6 }
  0xb2   : > { %1107 = vmatmul.f32.gmra.mxu3 %v3238_v60  ;;  %v679_v55 = vpop.f32.mrf.mxu1  ;;  %4133 = vst [vmem:[#allocation46_spill] sm:$0xff] %v3268_v53 }
  0xb3   : > { %v417_v58 = vpop.f32.mrf.mxu0  ;;  %v830_v37 = vpop.f32.mrf.mxu2 }
  0xb4   : > { %v680_v36 = vadd.f32 %v679_v55, %v417_v58  ;;  %v3278_v55 = vand.u32 4294901760, %v3268_v53  ;;  %v3280_v58 = vand.u32 4294901760, %v341_v50 }
  0xb5   : > { %v1012_v29 = vpop.f32.mrf.mxu3  ;;  %742 = vmatmul.f32.gmra.mxu1 %v3220_v19 }
  0xb6   : > { %v831_v43 = vadd.f32 %v830_v37, %v680_v36  ;;  %544 = vmatmul.f32.gmra.mxu0 %v3255_v46  ;;  %v3275_v36 = vand.u32 4294901760, %v550_v39  ;;  %4135 = vst [vmem:[#allocation48_spill] sm:$0xff] %v3278_v55  ;;  %v344_v39 = vsel %vm273_vm0, %v262_v16, 0 }
  0xb7   : > { %4136 = vst [vmem:[#allocation49_spill] sm:$0xff] %v3280_v58 }
  0xb8   : > { %v3271_v60 = vadd.f32 %v1012_v29, %v831_v43  ;;  %914 = vmatmul.f32.gmra.mxu2 %v3248_v3  ;;  %4134 = vst [vmem:[#allocation47_spill] sm:$0xff] %v3275_v36  ;;  %v558_v29 = vsub.f32 %v3268_v53, %v3278_v55  ;;  %v3288_v43 = vsub.f32 %v341_v50, %v3280_v58 }
  0xba   : > { %1113 = vmatmul.f32.gmra.mxu3 %v3258_v34  ;;  %v683_v15 = vpop.f32.mrf.mxu1  ;;  %4137 = vst [vmem:[#allocation50_spill] sm:$0xff] %v3288_v43 }
  0xbb   : > { %v425_v37 = vpop.f32.mrf.mxu0  ;;  %v835_v0 = vpop.f32.mrf.mxu2 }
  0xbc   : > { %v684_v22 = vadd.f32 %v683_v15, %v425_v37  ;;  %v3298_v15 = vand.u32 4294901760, %v3288_v43  ;;  %v3300_v37 = vand.u32 4294901760, %v344_v39 }
  0xbd   : > { %v1018_v18 = vpop.f32.mrf.mxu3  ;;  %746 = vmatmul.f32.gmra.mxu1 %v3240_v24  ;;  %v263_v24 = vld [vmem:[%s2882_s20 + $0xc0] sm:$0xff] }
  0xbe   : > { %v836_v32 = vadd.f32 %v835_v0, %v684_v22  ;;  %552 = vmatmul.f32.gmra.mxu0 %v3275_v36  ;;  %v3295_v22 = vand.u32 4294901760, %v558_v29  ;;  %4140 = vst [vmem:[#allocation53_spill] sm:$0xff] %v3298_v15  ;;  %v347_v29 = vsel %vm273_vm0, %v263_v24, 0 }
  0xbf   : > { %4141 = vst [vmem:[#allocation54_spill] sm:$0xff] %v3300_v37 }
  0xc0   : > { %v3291_v34 = vadd.f32 %v1018_v18, %v836_v32  ;;  %919 = vmatmul.f32.gmra.mxu2 %v3268_v53  ;;  %4139 = vst [vmem:[#allocation52_spill] sm:$0xff] %v3295_v22  ;;  %v566_v18 = vsub.f32 %v3288_v43, %v3298_v15  ;;  %v3308_v32 = vsub.f32 %v344_v39, %v3300_v37 }
  0xc2   : > { %4138 = vst [vmem:[#allocation51_spill] sm:$0xff] %v3291_v34  ;;  %1119 = vmatmul.f32.gmra.mxu3 %v3278_v55  ;;  %v687_v3 = vpop.f32.mrf.mxu1 }
  0xc3   : > { %v433_v0 = vpop.f32.mrf.mxu0  ;;  %v840_v50 = vpop.f32.mrf.mxu2  ;;  %4142 = vst [vmem:[#allocation55_spill] sm:$0xff] %v3308_v32 }
  0xc4   : > { %v688_v13 = vadd.f32 %v687_v3, %v433_v0  ;;  %v3318_v3 = vand.u32 4294901760, %v3308_v32  ;;  %v3320_v0 = vand.u32 4294901760, %v347_v29 }
  0xc5   : > { %v1024_v36 = vpop.f32.mrf.mxu3  ;;  %750 = vmatmul.f32.gmra.mxu1 %v3260_v6 }
  0xc6   : > { %v841_v16 = vadd.f32 %v840_v50, %v688_v13  ;;  %560 = vmatmul.f32.gmra.mxu0 %v3295_v22  ;;  %v3315_v13 = vand.u32 4294901760, %v566_v18  ;;  %4145 = vst [vmem:[#allocation58_spill] sm:$0xff] %v3318_v3  ;;  %v264_v22 = vld [vmem:[%s2882_s20 + $0xc8] sm:$0xff] }
  0xc7   : > { %4146 = vst [vmem:[#allocation59_spill] sm:$0xff] %v3320_v0  ;;  %v350_v18 = vsel %vm273_vm0, %v264_v22, 0 }
  0xc8   : > { %v3311_v55 = vadd.f32 %v1024_v36, %v841_v16  ;;  %924 = vmatmul.f32.gmra.mxu2 %v3288_v43  ;;  %4144 = vst [vmem:[#allocation57_spill] sm:$0xff] %v3315_v13  ;;  %v574_v36 = vsub.f32 %v3308_v32, %v3318_v3  ;;  %v3328_v16 = vsub.f32 %v347_v29, %v3320_v0 }
  0xca   : > { %4143 = vst [vmem:[#allocation56_spill] sm:$0xff] %v3311_v55  ;;  %1125 = vmatmul.f32.gmra.mxu3 %v3298_v15  ;;  %v691_v53 = vpop.f32.mrf.mxu1 }
  0xcb   : > { %v441_v50 = vpop.f32.mrf.mxu0  ;;  %v845_v39 = vpop.f32.mrf.mxu2  ;;  %4147 = vst [vmem:[#allocation60_spill] sm:$0xff] %v3328_v16 }
  0xcc   : > { %v692_v6 = vadd.f32 %v691_v53, %v441_v50  ;;  %v3338_v53 = vand.u32 4294901760, %v3328_v16  ;;  %v3340_v50 = vand.u32 4294901760, %v350_v18 }
  0xcd   : > { %v1030_v34 = vpop.f32.mrf.mxu3  ;;  %754 = vmatmul.f32.gmra.mxu1 %v3280_v58 }
  0xce   : > { %v846_v24 = vadd.f32 %v845_v39, %v692_v6  ;;  %568 = vmatmul.f32.gmra.mxu0 %v3315_v13  ;;  %v3335_v6 = vand.u32 4294901760, %v574_v36  ;;  %4150 = vst [vmem:[#allocation63_spill] sm:$0xff] %v3338_v53  ;;  %v265_v13 = vld [vmem:[%s2882_s20 + $0xd0] sm:$0xff] }
  0xcf   : > { %4151 = vst [vmem:[#allocation64_spill] sm:$0xff] %v3340_v50  ;;  %v353_v36 = vsel %vm273_vm0, %v265_v13, 0 }
  0xd0   : > { %v3331_v15 = vadd.f32 %v1030_v34, %v846_v24  ;;  %929 = vmatmul.f32.gmra.mxu2 %v3308_v32  ;;  %4149 = vst [vmem:[#allocation62_spill] sm:$0xff] %v3335_v6  ;;  %v582_v34 = vsub.f32 %v3328_v16, %v3338_v53  ;;  %v3348_v24 = vsub.f32 %v350_v18, %v3340_v50 }
  0xd2   : > { %4148 = vst [vmem:[#allocation61_spill] sm:$0xff] %v3331_v15  ;;  %1131 = vmatmul.f32.gmra.mxu3 %v3318_v3  ;;  %v695_v43 = vpop.f32.mrf.mxu1 }
  0xd3   : > { %v449_v39 = vpop.f32.mrf.mxu0  ;;  %v850_v29 = vpop.f32.mrf.mxu2  ;;  %4152 = vst [vmem:[#allocation65_spill] sm:$0xff] %v3348_v24 }
  0xd4   : > { %v696_v58 = vadd.f32 %v695_v43, %v449_v39  ;;  %v3358_v43 = vand.u32 4294901760, %v3348_v24  ;;  %v3360_v39 = vand.u32 4294901760, %v353_v36 }
  0xd5   : > { %v1036_v55 = vpop.f32.mrf.mxu3  ;;  %758 = vmatmul.f32.gmra.mxu1 %v3300_v37 }
  0xd6   : > { %v851_v22 = vadd.f32 %v850_v29, %v696_v58  ;;  %576 = vmatmul.f32.gmra.mxu0 %v3335_v6  ;;  %v3355_v58 = vand.u32 4294901760, %v582_v34  ;;  %4155 = vst [vmem:[#allocation68_spill] sm:$0xff] %v3358_v43  ;;  %v266_v6 = vld [vmem:[%s2882_s20 + $0xd8] sm:$0xff] }
  0xd7   : > { %4156 = vst [vmem:[#allocation69_spill] sm:$0xff] %v3360_v39  ;;  %v356_v34 = vsel %vm273_vm0, %v266_v6, 0 }
  0xd8   : > { %v3351_v3 = vadd.f32 %v1036_v55, %v851_v22  ;;  %934 = vmatmul.f32.gmra.mxu2 %v3328_v16  ;;  %4154 = vst [vmem:[#allocation67_spill] sm:$0xff] %v3355_v58  ;;  %v590_v55 = vsub.f32 %v3348_v24, %v3358_v43  ;;  %v3368_v22 = vsub.f32 %v353_v36, %v3360_v39 }
  0xda   : > { %4153 = vst [vmem:[#allocation66_spill] sm:$0xff] %v3351_v3  ;;  %1137 = vmatmul.f32.gmra.mxu3 %v3338_v53  ;;  %v699_v32 = vpop.f32.mrf.mxu1 }
  0xdb   : > { %v457_v29 = vpop.f32.mrf.mxu0  ;;  %v855_v18 = vpop.f32.mrf.mxu2  ;;  %4157 = vst [vmem:[#allocation70_spill] sm:$0xff] %v3368_v22 }
  0xdc   : > { %v700_v37 = vadd.f32 %v699_v32, %v457_v29  ;;  %v3378_v32 = vand.u32 4294901760, %v3368_v22  ;;  %v3380_v29 = vand.u32 4294901760, %v356_v34 }
  0xdd   : > { %v1042_v15 = vpop.f32.mrf.mxu3  ;;  %762 = vmatmul.f32.gmra.mxu1 %v3320_v0 }
  0xde   : > { %v856_v13 = vadd.f32 %v855_v18, %v700_v37  ;;  %584 = vmatmul.f32.gmra.mxu0 %v3355_v58  ;;  %v3375_v37 = vand.u32 4294901760, %v590_v55  ;;  %4160 = vst [vmem:[#allocation73_spill] sm:$0xff] %v3378_v32  ;;  %v267_v58 = vld [vmem:[%s2882_s20 + $0xe0] sm:$0xff] }
  0xdf   : > { %4161 = vst [vmem:[#allocation74_spill] sm:$0xff] %v3380_v29  ;;  %v359_v55 = vsel %vm273_vm0, %v267_v58, 0 }
  0xe0   : > { %v3371_v53 = vadd.f32 %v1042_v15, %v856_v13  ;;  %939 = vmatmul.f32.gmra.mxu2 %v3348_v24  ;;  %4159 = vst [vmem:[#allocation72_spill] sm:$0xff] %v3375_v37  ;;  %v598_v15 = vsub.f32 %v3368_v22, %v3378_v32  ;;  %v3388_v13 = vsub.f32 %v356_v34, %v3380_v29 }
  0xe2   : > { %4158 = vst [vmem:[#allocation71_spill] sm:$0xff] %v3371_v53  ;;  %1143 = vmatmul.f32.gmra.mxu3 %v3358_v43  ;;  %v703_v16 = vpop.f32.mrf.mxu1 }
  0xe3   : > { %v465_v18 = vpop.f32.mrf.mxu0  ;;  %v860_v36 = vpop.f32.mrf.mxu2  ;;  %4162 = vst [vmem:[#allocation75_spill] sm:$0xff] %v3388_v13 }
  0xe4   : > { %v704_v0 = vadd.f32 %v703_v16, %v465_v18  ;;  %v3398_v16 = vand.u32 4294901760, %v3388_v13  ;;  %v3400_v18 = vand.u32 4294901760, %v359_v55 }
  0xe5   : > { %v1048_v3 = vpop.f32.mrf.mxu3  ;;  %766 = vmatmul.f32.gmra.mxu1 %v3340_v50 }
  0xe6   : > { %v861_v6 = vadd.f32 %v860_v36, %v704_v0  ;;  %592 = vmatmul.f32.gmra.mxu0 %v3375_v37  ;;  %v3395_v0 = vand.u32 4294901760, %v598_v15  ;;  %4165 = vst [vmem:[#allocation78_spill] sm:$0xff] %v3398_v16  ;;  %v268_v37 = vld [vmem:[%s2882_s20 + $0xe8] sm:$0xff] }
  0xe7   : > { %4166 = vst [vmem:[#allocation79_spill] sm:$0xff] %v3400_v18  ;;  %v362_v15 = vsel %vm273_vm0, %v268_v37, 0 }
  0xe8   : > { %v3391_v43 = vadd.f32 %v1048_v3, %v861_v6  ;;  %944 = vmatmul.f32.gmra.mxu2 %v3368_v22  ;;  %4164 = vst [vmem:[#allocation77_spill] sm:$0xff] %v3395_v0  ;;  %v606_v3 = vsub.f32 %v3388_v13, %v3398_v16  ;;  %v3408_v6 = vsub.f32 %v359_v55, %v3400_v18 }
  0xea   : > { %4163 = vst [vmem:[#allocation76_spill] sm:$0xff] %v3391_v43  ;;  %1149 = vmatmul.f32.gmra.mxu3 %v3378_v32  ;;  %v707_v24 = vpop.f32.mrf.mxu1 }
  0xeb   : > { %v473_v36 = vpop.f32.mrf.mxu0  ;;  %v865_v34 = vpop.f32.mrf.mxu2  ;;  %4167 = vst [vmem:[#allocation80_spill] sm:$0xff] %v3408_v6 }
  0xec   : > { %v708_v50 = vadd.f32 %v707_v24, %v473_v36  ;;  %v3418_v24 = vand.u32 4294901760, %v3408_v6  ;;  %v3420_v36 = vand.u32 4294901760, %v362_v15 }
  0xed   : > { %v1054_v53 = vpop.f32.mrf.mxu3  ;;  %770 = vmatmul.f32.gmra.mxu1 %v3360_v39 }
  0xee   : > { %v866_v58 = vadd.f32 %v865_v34, %v708_v50  ;;  %600 = vmatmul.f32.gmra.mxu0 %v3395_v0  ;;  %v3415_v50 = vand.u32 4294901760, %v606_v3  ;;  %4170 = vst [vmem:[#allocation83_spill] sm:$0xff] %v3418_v24  ;;  %v269_v0 = vld [vmem:[%s2882_s20 + $0xf0] sm:$0xff] }
  0xef   : > { %4171 = vst [vmem:[#allocation84_spill] sm:$0xff] %v3420_v36  ;;  %v365_v3 = vsel %vm273_vm0, %v269_v0, 0 }
  0xf0   : > { %v3411_v32 = vadd.f32 %v1054_v53, %v866_v58  ;;  %949 = vmatmul.f32.gmra.mxu2 %v3388_v13  ;;  %4169 = vst [vmem:[#allocation82_spill] sm:$0xff] %v3415_v50  ;;  %v614_v53 = vsub.f32 %v3408_v6, %v3418_v24  ;;  %v3428_v58 = vsub.f32 %v362_v15, %v3420_v36 }
  0xf2   : > { %4168 = vst [vmem:[#allocation81_spill] sm:$0xff] %v3411_v32  ;;  %1155 = vmatmul.f32.gmra.mxu3 %v3398_v16  ;;  %v711_v22 = vpop.f32.mrf.mxu1 }
  0xf3   : > { %v481_v34 = vpop.f32.mrf.mxu0  ;;  %v870_v55 = vpop.f32.mrf.mxu2  ;;  %4172 = vst [vmem:[#allocation85_spill] sm:$0xff] %v3428_v58 }
  0xf4   : > { %v712_v39 = vadd.f32 %v711_v22, %v481_v34  ;;  %v3438_v22 = vand.u32 4294901760, %v3428_v58  ;;  %v3440_v34 = vand.u32 4294901760, %v365_v3 }
  0xf5   : > { %v1060_v43 = vpop.f32.mrf.mxu3  ;;  %774 = vmatmul.f32.gmra.mxu1 %v3380_v29 }
  0xf6   : > { %v871_v37 = vadd.f32 %v870_v55, %v712_v39  ;;  %608 = vmatmul.f32.gmra.mxu0 %v3415_v50  ;;  %v3435_v39 = vand.u32 4294901760, %v614_v53  ;;  %4175 = vst [vmem:[#allocation88_spill] sm:$0xff] %v3438_v22  ;;  %v270_v50 = vld [vmem:[%s2882_s20 + $0xf8] sm:$0xff] }
  0xf7   : > { %v368_v53 = vsel %vm273_vm0, %v270_v50, 0 }
  0xf8   : > { %v3431_v16 = vadd.f32 %v1060_v43, %v871_v37  ;;  %954 = vmatmul.f32.gmra.mxu2 %v3408_v6  ;;  %4174 = vst [vmem:[#allocation87_spill] sm:$0xff] %v3435_v39  ;;  %v622_v43 = vsub.f32 %v3428_v58, %v3438_v22  ;;  %v3448_v37 = vsub.f32 %v365_v3, %v3440_v34 }
  0xfa   : > { %4173 = vst [vmem:[#allocation86_spill] sm:$0xff] %v3431_v16  ;;  %1161 = vmatmul.f32.gmra.mxu3 %v3418_v24  ;;  %v715_v13 = vpop.f32.mrf.mxu1 }
  0xfb   : > { %v489_v55 = vpop.f32.mrf.mxu0  ;;  %v875_v15 = vpop.f32.mrf.mxu2  ;;  %4176 = vst [vmem:[#allocation89_spill] sm:$0xff] %v3448_v37 }
  0xfc   : > { %v716_v29 = vadd.f32 %v715_v13, %v489_v55  ;;  %v3455_v13 = vand.u32 4294901760, %v622_v43  ;;  %v3460_v55 = vand.u32 4294901760, %v368_v53 }
  0xfd   : > { %v1066_v32 = vpop.f32.mrf.mxu3  ;;  %778 = vmatmul.f32.gmra.mxu1 %v3400_v18 }
  0xfe   : > { %v876_v0 = vadd.f32 %v875_v15, %v716_v29  ;;  %616 = vmatmul.f32.gmra.mxu0 %v3435_v39  ;;  %v3458_v29 = vand.u32 4294901760, %v3448_v37  ;;  %v3467_v50 = vsub.f32 %v368_v53, %v3460_v55 }
 0x100   : > { %v3451_v24 = vadd.f32 %v1066_v32, %v876_v0  ;;  %959 = vmatmul.f32.gmra.mxu2 %v3428_v58  ;;  %4177 = vst [vmem:[#allocation90_spill] sm:$0xff] %v3458_v29  ;;  %v630_v32 = vsub.f32 %v3448_v37, %v3458_v29 }
 0x101   : > { %4178 = vst [vmem:[#allocation91_spill] sm:$0xff] %v3467_v50 }
 0x102   : > { %1167 = vmatmul.f32.gmra.mxu3 %v3438_v22  ;;  %v719_v6 = vpop.f32.mrf.mxu1 }
 0x103   : > { %v497_v15 = vpop.f32.mrf.mxu0  ;;  %v880_v3 = vpop.f32.mrf.mxu2 }
 0x104   : > { %v720_v18 = vadd.f32 %v719_v6, %v497_v15  ;;  %v3473_v6 = vand.u32 4294901760, %v630_v32 }
 0x105   : > { %v1072_v39 = vpop.f32.mrf.mxu3  ;;  %782 = vmatmul.f32.gmra.mxu1 %v3420_v36 }
 0x106   : > { %v881_v16 = vadd.f32 %v880_v3, %v720_v18  ;;  %624 = vmatmul.f32.gmra.mxu0 %v3455_v13  ;;  %v3476_v18 = vand.u32 4294901760, %v3467_v50 }
 0x108   : > { %v3469_v0 = vadd.f32 %v1072_v39, %v881_v16  ;;  %964 = vmatmul.f32.gmra.mxu2 %v3448_v37  ;;  %4179 = vst [vmem:[#allocation92_spill] sm:$0xff] %v3476_v18  ;;  %v638_v16 = vsub.f32 %v3467_v50, %v3476_v18 }
 0x10a   : > { %1173 = vmatmul.f32.gmra.mxu3 %v3458_v29  ;;  %v723_v15 = vpop.f32.mrf.mxu1  ;;  %v3486_v53 = vand.u32 4294901760, %v638_v16 }
 0x10b   : > { %v505_v43 = vpop.f32.mrf.mxu0  ;;  %v885_v22 = vpop.f32.mrf.mxu2 }
 0x10c   : > { %v724_v3 = vadd.f32 %v723_v15, %v505_v43 }
 0x10d   : > { %v1078_v58 = vpop.f32.mrf.mxu3  ;;  %786 = vmatmul.f32.gmra.mxu1 %v3440_v34 }
 0x10e   : > { %v886_v36 = vadd.f32 %v885_v22, %v724_v3  ;;  %632 = vmatmul.f32.gmra.mxu0 %v3473_v6 }
 0x110   : > { %v3482_v39 = vadd.f32 %v1078_v58, %v886_v36  ;;  %969 = vmatmul.f32.gmra.mxu2 %v3467_v50 }
 0x112   : > { %4180 = vst [vmem:[#allocation93_spill] sm:$0xff] %v3482_v39  ;;  %1179 = vmatmul.f32.gmra.mxu3 %v3476_v18  ;;  %v727_v43 = vpop.f32.mrf.mxu1 }
 0x113   : > { %v513_v32 = vpop.f32.mrf.mxu0  ;;  %v890_v29 = vpop.f32.mrf.mxu2 }
 0x114   : > { %v728_v15 = vadd.f32 %v727_v43, %v513_v32 }
 0x115   : > { %v1084_v22 = vpop.f32.mrf.mxu3  ;;  %790 = vmatmul.f32.gmra.mxu1 %v3460_v55 }
 0x116   : > { %v891_v3 = vadd.f32 %v890_v29, %v728_v15  ;;  %640 = vmatmul.f32.gmra.mxu0 %v3486_v53 }
 0x118   : > { %v3490_v37 = vadd.f32 %v1084_v22, %v891_v3  ;;  %1499 = vmatmul.f32.vlgmr.msrb.gmra.mxu2 %v2912_v26 }
 0x11a   : > { %1773 = vmatmul.f32.vlgmr.msrb.gmra.mxu3 %v2887_v7  ;;  %v731_v58 = vpop.f32.mrf.mxu1 }
 0x11b   : > { %v521_v36 = vpop.f32.mrf.mxu0  ;;  %v895_v18 = vpop.f32.mrf.mxu2 }
 0x11c   : > { %v732_v16 = vadd.f32 %v731_v58, %v521_v36 }
 0x11d   : > { %v1090_v50 = vpop.f32.mrf.mxu3  ;;  %1349 = vmatmul.f32.vlgmr.msrb.gmra.mxu1 %v2887_v7 }
 0x11e   : > { %v896_v39 = vadd.f32 %v895_v18, %v732_v16  ;;  %1203 = vmatmul.f32.vlgmr.msrb.gmra.mxu0 %v2887_v7 }
 0x120   : > { %v3496_v29 = vadd.f32 %v1090_v50, %v896_v39  ;;  %1507 = vmatmul.f32.gmra.mxu2 %v2925_v31 }
 0x122   : > { %1777 = vmatmul.f32.gmra.mxu3 %v2891_v12  ;;  %v735_v26 = vpop.f32.mrf.mxu1 }
 0x123   : > { %v529_v32 = vpop.f32.mrf.mxu0  ;;  %v900_v15 = vpop.f32.mrf.mxu2 }
 0x124   : > { %v736_v43 = vadd.f32 %v735_v26, %v529_v32 }
 0x125   : > { %v1096_v22 = vpop.f32.mrf.mxu3  ;;  %1353 = vmatmul.f32.gmra.mxu1 %v2891_v12 }
 0x126   : > { %v901_v3 = vadd.f32 %v900_v15, %v736_v43  ;;  %1207 = vmatmul.f32.gmra.mxu0 %v2891_v12 }
 0x128   : > { %v3502_v18 = vadd.f32 %v1096_v22, %v901_v3  ;;  %1515 = vmatmul.f32.gmra.mxu2 %v2943_v38 }
 0x12a   : > { %1781 = vmatmul.f32.gmra.mxu3 %v2910_v23  ;;  %v739_v31 = vpop.f32.mrf.mxu1 }
 0x12b   : > { %v537_v50 = vpop.f32.mrf.mxu0  ;;  %v905_v36 = vpop.f32.mrf.mxu2 }
 0x12c   : > { %v740_v39 = vadd.f32 %v739_v31, %v537_v50 }
 0x12d   : > { %v1102_v58 = vpop.f32.mrf.mxu3  ;;  %1357 = vmatmul.f32.gmra.mxu1 %v2910_v23 }
 0x12e   : > { %v906_v16 = vadd.f32 %v905_v36, %v740_v39  ;;  %1211 = vmatmul.f32.gmra.mxu0 %v2910_v23 }
 0x130   : > { %v3508_v32 = vadd.f32 %v1102_v58, %v906_v16  ;;  %1523 = vmatmul.f32.gmra.mxu2 %v2961_v45 }
 0x132   : > { %1785 = vmatmul.f32.gmra.mxu3 %v2930_v33  ;;  %v743_v38 = vpop.f32.mrf.mxu1 }
 0x133   : > { %v545_v26 = vpop.f32.mrf.mxu0  ;;  %v910_v15 = vpop.f32.mrf.mxu2 }
 0x134   : > { %v744_v43 = vadd.f32 %v743_v38, %v545_v26 }
 0x135   : > { %v1108_v22 = vpop.f32.mrf.mxu3  ;;  %1361 = vmatmul.f32.gmra.mxu1 %v2930_v33 }
 0x136   : > { %v911_v3 = vadd.f32 %v910_v15, %v744_v43  ;;  %1215 = vmatmul.f32.gmra.mxu0 %v2930_v33 }
 0x138   : > { %v3514_v50 = vadd.f32 %v1108_v22, %v911_v3  ;;  %1531 = vmatmul.f32.gmra.mxu2 %v2979_v52 }
 0x13a   : > { %1789 = vmatmul.f32.gmra.mxu3 %v2948_v40  ;;  %v747_v45 = vpop.f32.mrf.mxu1 }
 0x13b   : > { %v553_v31 = vpop.f32.mrf.mxu0  ;;  %v915_v36 = vpop.f32.mrf.mxu2 }
 0x13c   : > { %v748_v39 = vadd.f32 %v747_v45, %v553_v31 }
 0x13d   : > { %v1114_v58 = vpop.f32.mrf.mxu3  ;;  %1365 = vmatmul.f32.gmra.mxu1 %v2948_v40 }
 0x13e   : > { %v916_v16 = vadd.f32 %v915_v36, %v748_v39  ;;  %1219 = vmatmul.f32.gmra.mxu0 %v2948_v40 }
 0x140   : > { %v3520_v26 = vadd.f32 %v1114_v58, %v916_v16  ;;  %1539 = vmatmul.f32.gmra.mxu2 %v2997_v59 }
 0x142   : > { %1793 = vmatmul.f32.gmra.mxu3 %v2966_v47  ;;  %v751_v52 = vpop.f32.mrf.mxu1 }
 0x143   : > { %v561_v38 = vpop.f32.mrf.mxu0  ;;  %v920_v15 = vpop.f32.mrf.mxu2 }
 0x144   : > { %v752_v43 = vadd.f32 %v751_v52, %v561_v38 }
 0x145   : > { %v1120_v22 = vpop.f32.mrf.mxu3  ;;  %1369 = vmatmul.f32.gmra.mxu1 %v2966_v47 }
 0x146   : > { %v921_v3 = vadd.f32 %v920_v15, %v752_v43  ;;  %1223 = vmatmul.f32.gmra.mxu0 %v2966_v47 }
 0x148   : > { %v3526_v31 = vadd.f32 %v1120_v22, %v921_v3  ;;  %1547 = vmatmul.f32.gmra.mxu2 %v3015_v2 }
 0x14a   : > { %1797 = vmatmul.f32.gmra.mxu3 %v2984_v54  ;;  %v755_v59 = vpop.f32.mrf.mxu1 }
 0x14b   : > { %v569_v45 = vpop.f32.mrf.mxu0  ;;  %v925_v36 = vpop.f32.mrf.mxu2 }
 0x14c   : > { %v756_v39 = vadd.f32 %v755_v59, %v569_v45 }
 0x14d   : > { %v1126_v58 = vpop.f32.mrf.mxu3  ;;  %1373 = vmatmul.f32.gmra.mxu1 %v2984_v54 }
 0x14e   : > { %v926_v16 = vadd.f32 %v925_v36, %v756_v39  ;;  %1227 = vmatmul.f32.gmra.mxu0 %v2984_v54 }
 0x150   : > { %v3532_v38 = vadd.f32 %v1126_v58, %v926_v16  ;;  %1555 = vmatmul.f32.gmra.mxu2 %v3033_v10 }
 0x152   : > { %1801 = vmatmul.f32.gmra.mxu3 %v3002_v61  ;;  %v759_v2 = vpop.f32.mrf.mxu1 }
 0x153   : > { %v577_v52 = vpop.f32.mrf.mxu0  ;;  %v930_v15 = vpop.f32.mrf.mxu2 }
 0x154   : > { %v760_v43 = vadd.f32 %v759_v2, %v577_v52 }
 0x155   : > { %v1132_v22 = vpop.f32.mrf.mxu3  ;;  %1377 = vmatmul.f32.gmra.mxu1 %v3002_v61 }
 0x156   : > { %v931_v3 = vadd.f32 %v930_v15, %v760_v43  ;;  %1231 = vmatmul.f32.gmra.mxu0 %v3002_v61 }
 0x158   : > { %v3538_v45 = vadd.f32 %v1132_v22, %v931_v3  ;;  %1563 = vmatmul.f32.gmra.mxu2 %v3051_v21 }
 0x15a   : > { %1805 = vmatmul.f32.gmra.mxu3 %v3020_v4  ;;  %v763_v10 = vpop.f32.mrf.mxu1 }
 0x15b   : > { %v585_v59 = vpop.f32.mrf.mxu0  ;;  %v935_v36 = vpop.f32.mrf.mxu2 }
 0x15c   : > { %v764_v39 = vadd.f32 %v763_v10, %v585_v59 }
 0x15d   : > { %v1138_v58 = vpop.f32.mrf.mxu3  ;;  %1381 = vmatmul.f32.gmra.mxu1 %v3020_v4 }
 0x15e   : > { %v936_v16 = vadd.f32 %v935_v36, %v764_v39  ;;  %1235 = vmatmul.f32.gmra.mxu0 %v3020_v4 }
 0x160   : > { %v3544_v52 = vadd.f32 %v1138_v58, %v936_v16  ;;  %1571 = vmatmul.f32.gmra.mxu2 %v3069_v35 }
 0x162   : > { %1809 = vmatmul.f32.gmra.mxu3 %v3038_v14  ;;  %v767_v21 = vpop.f32.mrf.mxu1 }
 0x163   : > { %v593_v2 = vpop.f32.mrf.mxu0  ;;  %v940_v15 = vpop.f32.mrf.mxu2 }
 0x164   : > { %v768_v43 = vadd.f32 %v767_v21, %v593_v2 }
 0x165   : > { %v1144_v22 = vpop.f32.mrf.mxu3  ;;  %1385 = vmatmul.f32.gmra.mxu1 %v3038_v14 }
 0x166   : > { %v941_v3 = vadd.f32 %v940_v15, %v768_v43  ;;  %1239 = vmatmul.f32.gmra.mxu0 %v3038_v14 }
 0x168   : > { %v3550_v59 = vadd.f32 %v1144_v22, %v941_v3  ;;  %1579 = vmatmul.f32.gmra.mxu2 %v3087_v51 }
 0x16a   : > { %1813 = vmatmul.f32.gmra.mxu3 %v3056_v25  ;;  %v771_v35 = vpop.f32.mrf.mxu1 }
 0x16b   : > { %v601_v10 = vpop.f32.mrf.mxu0  ;;  %v945_v36 = vpop.f32.mrf.mxu2 }
 0x16c   : > { %v772_v39 = vadd.f32 %v771_v35, %v601_v10 }
 0x16d   : > { %v1150_v58 = vpop.f32.mrf.mxu3  ;;  %1389 = vmatmul.f32.gmra.mxu1 %v3056_v25 }
 0x16e   : > { %v946_v16 = vadd.f32 %v945_v36, %v772_v39  ;;  %1243 = vmatmul.f32.gmra.mxu0 %v3056_v25 }
 0x170   : > { %v3556_v2 = vadd.f32 %v1150_v58, %v946_v16  ;;  %1587 = vmatmul.f32.gmra.mxu2 %v3105_v5 }
 0x172   : > { %1817 = vmatmul.f32.gmra.mxu3 %v3074_v41  ;;  %v775_v51 = vpop.f32.mrf.mxu1 }
 0x173   : > { %v609_v21 = vpop.f32.mrf.mxu0  ;;  %v950_v15 = vpop.f32.mrf.mxu2 }
 0x174   : > { %v776_v43 = vadd.f32 %v775_v51, %v609_v21 }
 0x175   : > { %v1156_v22 = vpop.f32.mrf.mxu3  ;;  %1393 = vmatmul.f32.gmra.mxu1 %v3074_v41 }
 0x176   : > { %v951_v3 = vadd.f32 %v950_v15, %v776_v43  ;;  %1247 = vmatmul.f32.gmra.mxu0 %v3074_v41 }
 0x178   : > { %v3562_v10 = vadd.f32 %v1156_v22, %v951_v3  ;;  %1595 = vmatmul.f32.gmra.mxu2 %v3123_v28 }
 0x17a   : > { %1821 = vmatmul.f32.gmra.mxu3 %v3092_v56  ;;  %v779_v5 = vpop.f32.mrf.mxu1 }
 0x17b   : > { %v617_v35 = vpop.f32.mrf.mxu0  ;;  %v955_v36 = vpop.f32.mrf.mxu2 }
 0x17c   : > { %v780_v39 = vadd.f32 %v779_v5, %v617_v35 }
 0x17d   : > { %v1162_v58 = vpop.f32.mrf.mxu3  ;;  %1397 = vmatmul.f32.gmra.mxu1 %v3092_v56 }
 0x17e   : > { %v956_v16 = vadd.f32 %v955_v36, %v780_v39  ;;  %1251 = vmatmul.f32.gmra.mxu0 %v3092_v56 }
 0x180   : > { %v3568_v21 = vadd.f32 %v1162_v58, %v956_v16  ;;  %1603 = vmatmul.f32.gmra.mxu2 %v3141_v1 }
 0x182   : > { %1825 = vmatmul.f32.gmra.mxu3 %v3110_v9  ;;  %v783_v28 = vpop.f32.mrf.mxu1 }
 0x183   : > { %v625_v51 = vpop.f32.mrf.mxu0  ;;  %v960_v15 = vpop.f32.mrf.mxu2 }
 0x184   : > { %v784_v43 = vadd.f32 %v783_v28, %v625_v51 }
 0x185   : > { %v1168_v22 = vpop.f32.mrf.mxu3  ;;  %1401 = vmatmul.f32.gmra.mxu1 %v3110_v9 }
 0x186   : > { %v961_v3 = vadd.f32 %v960_v15, %v784_v43  ;;  %1255 = vmatmul.f32.gmra.mxu0 %v3110_v9 }
 0x188   : > { %v3574_v35 = vadd.f32 %v1168_v22, %v961_v3  ;;  %1611 = vmatmul.f32.gmra.mxu2 %v3159_v49 }
 0x18a   : > { %1829 = vmatmul.f32.gmra.mxu3 %v3128_v42  ;;  %v787_v1 = vpop.f32.mrf.mxu1 }
 0x18b   : > { %v633_v5 = vpop.f32.mrf.mxu0  ;;  %v965_v36 = vpop.f32.mrf.mxu2 }
 0x18c   : > { %v788_v39 = vadd.f32 %v787_v1, %v633_v5 }
 0x18d   : > { %v1174_v58 = vpop.f32.mrf.mxu3  ;;  %1405 = vmatmul.f32.gmra.mxu1 %v3128_v42 }
 0x18e   : > { %v966_v16 = vadd.f32 %v965_v36, %v788_v39  ;;  %1259 = vmatmul.f32.gmra.mxu0 %v3128_v42 }
 0x190   : > { %v3580_v51 = vadd.f32 %v1174_v58, %v966_v16  ;;  %1619 = vmatmul.f32.gmra.mxu2 %v3177_v27 }
 0x192   : > { %1833 = vmatmul.f32.gmra.mxu3 %v3146_v17  ;;  %v791_v28 = vpop.f32.mrf.mxu1 }
 0x193   : > { %v641_v49 = vpop.f32.mrf.mxu0  ;;  %v970_v15 = vpop.f32.mrf.mxu2 }
 0x194   : > { %v792_v43 = vadd.f32 %v791_v28, %v641_v49 }
 0x195   : > { %v1180_v22 = vpop.f32.mrf.mxu3  ;;  %1409 = vmatmul.f32.gmra.mxu1 %v3146_v17 }
 0x196   : > { %v971_v3 = vadd.f32 %v970_v15, %v792_v43  ;;  %1263 = vmatmul.f32.gmra.mxu0 %v3146_v17 }
 0x198   : > { %v3586_v5 = vadd.f32 %v1180_v22, %v971_v3  ;;  %1627 = vmatmul.f32.gmra.mxu2 %v3195_v20 }
 0x19a   : > { %1837 = vmatmul.f32.gmra.mxu3 %v3164_v63  ;;  %v1350_v1 = vpop.f32.mrf.mxu1 }
 0x19b   : > { %v1204_v27 = vpop.f32.mrf.mxu0  ;;  %v1500_v36 = vpop.f32.mrf.mxu2 }
 0x19c   : > { %v1205_v39 = vadd.f32 %v1204_v27, %v3211_v62 }
 0x19d   : > { %v1774_v58 = vpop.f32.mrf.mxu3  ;;  %1413 = vmatmul.f32.gmra.mxu1 %v3164_v63 }
 0x19e   : > { %v1351_v16 = vadd.f32 %v1350_v1, %v1205_v39  ;;  %1267 = vmatmul.f32.gmra.mxu0 %v3164_v63  ;;  %v3598_v20 = vadd.f32 %v1774_v58, %v1500_v36 }
 0x1a0   : > { %2584 = vst [vmem:[%s3595_s24] sm:$0xff] %v1351_v16  ;;  %1635 = vmatmul.f32.gmra.mxu2 %v3215_v8 }
 0x1a2   : > { %1841 = vmatmul.f32.gmra.mxu3 %v3182_v48  ;;  %v1354_v49 = vpop.f32.mrf.mxu1 }
 0x1a3   : > { %v1208_v62 = vpop.f32.mrf.mxu0  ;;  %v1508_v43 = vpop.f32.mrf.mxu2 }
 0x1a4   : > { %v1209_v28 = vadd.f32 %v1208_v62, %v3231_v44 }
 0x1a5   : > { %v1778_v15 = vpop.f32.mrf.mxu3  ;;  %1417 = vmatmul.f32.gmra.mxu1 %v3182_v48 }
 0x1a6   : > { %v1355_v22 = vadd.f32 %v1354_v49, %v1209_v28  ;;  %1271 = vmatmul.f32.gmra.mxu0 %v3182_v48  ;;  %v3606_v3 = vadd.f32 %v1778_v15, %v1508_v43  ;;  %v4181_v15 = vld [vmem:[#allocation47_spill] sm:$0xff] }
 0x1a8   : > { %2586 = vst [vmem:[%s3595_s24 + $0x10] sm:$0xff] %v1355_v22  ;;  %1643 = vmatmul.f32.gmra.mxu2 %v3235_v57 }
 0x1aa   : > { %1845 = vmatmul.f32.gmra.mxu3 %v3200_v30  ;;  %v1358_v27 = vpop.f32.mrf.mxu1 }
 0x1ab   : > { %v1212_v8 = vpop.f32.mrf.mxu0  ;;  %v1516_v44 = vpop.f32.mrf.mxu2 }
 0x1ac   : > { %v1213_v1 = vadd.f32 %v1212_v8, %v3251_v11 }
 0x1ad   : > { %v1782_v39 = vpop.f32.mrf.mxu3  ;;  %1421 = vmatmul.f32.gmra.mxu1 %v3200_v30 }
 0x1ae   : > { %v1359_v36 = vadd.f32 %v1358_v27, %v1213_v1  ;;  %1275 = vmatmul.f32.gmra.mxu0 %v3200_v30  ;;  %v3614_v58 = vadd.f32 %v1782_v39, %v1516_v44  ;;  %v4183_v27 = vld [vmem:[#allocation51_spill] sm:$0xff] }
 0x1b0   : > { %2588 = vst [vmem:[%s3595_s24 + $0x20] sm:$0xff] %v1359_v36  ;;  %1651 = vmatmul.f32.gmra.mxu2 %v3255_v46  ;;  %v4182_v46 = vld [vmem:[#allocation42_spill] sm:$0xff] }
 0x1b2   : > { %1849 = vmatmul.f32.gmra.mxu3 %v3220_v19  ;;  %v1362_v16 = vpop.f32.mrf.mxu1 }
 0x1b3   : > { %v1216_v57 = vpop.f32.mrf.mxu0  ;;  %v1524_v11 = vpop.f32.mrf.mxu2 }
 0x1b4   : > { %v1217_v62 = vadd.f32 %v1216_v57, %v3271_v60  ;;  %v4185_v57 = vld [vmem:[#allocation52_spill] sm:$0xff] }
 0x1b5   : > { %v1786_v49 = vpop.f32.mrf.mxu3  ;;  %1425 = vmatmul.f32.gmra.mxu1 %v3220_v19 }
 0x1b6   : > { %v1363_v28 = vadd.f32 %v1362_v16, %v1217_v62  ;;  %1279 = vmatmul.f32.gmra.mxu0 %v3220_v19  ;;  %v3622_v43 = vadd.f32 %v1786_v49, %v1524_v11  ;;  %v4186_v16 = vld [vmem:[#allocation45_spill] sm:$0xff]  ;;  %v4187_v49 = vld [vmem:[#allocation56_spill] sm:$0xff] }
 0x1b8   : > { %2590 = vst [vmem:[%s3595_s24 + $0x30] sm:$0xff] %v1363_v28  ;;  %1659 = vmatmul.f32.gmra.mxu2 %v4181_v15 }
 0x1ba   : > { %1853 = vmatmul.f32.gmra.mxu3 %v4182_v46  ;;  %v1366_v8 = vpop.f32.mrf.mxu1 }
 0x1bb   : > { %v1220_v22 = vpop.f32.mrf.mxu0  ;;  %v1532_v60 = vpop.f32.mrf.mxu2 }
 0x1bc   : > { %v1221_v1 = vadd.f32 %v1220_v22, %v4183_v27 }
 0x1bd   : > { %v1790_v44 = vpop.f32.mrf.mxu3  ;;  %1429 = vmatmul.f32.gmra.mxu1 %v4182_v46 }
 0x1be   : > { %v1367_v39 = vadd.f32 %v1366_v8, %v1221_v1  ;;  %1283 = vmatmul.f32.gmra.mxu0 %v4182_v46  ;;  %v3630_v36 = vadd.f32 %v1790_v44, %v1532_v60  ;;  %v4189_v1 = vld [vmem:[#allocation57_spill] sm:$0xff] }
 0x1bf   : > { %v4190_v60 = vld [vmem:[#allocation49_spill] sm:$0xff] }
 0x1c0   : > { %4184 = vst [vmem:[#allocation47_spill] sm:$0xff] %v3630_v36  ;;  %1667 = vmatmul.f32.gmra.mxu2 %v4185_v57  ;;  %v4191_v57 = vld [vmem:[#allocation61_spill] sm:$0xff] }
 0x1c1   : > { %2592 = vst [vmem:[%s3595_s24 + $0x40] sm:$0xff] %v1367_v39 }
 0x1c2   : > { %1857 = vmatmul.f32.gmra.mxu3 %v4186_v16  ;;  %v1370_v11 = vpop.f32.mrf.mxu1 }
 0x1c3   : > { %v1224_v62 = vpop.f32.mrf.mxu0  ;;  %v1540_v15 = vpop.f32.mrf.mxu2 }
 0x1c4   : > { %v1225_v28 = vadd.f32 %v1224_v62, %v4187_v49 }
 0x1c5   : > { %v1794_v22 = vpop.f32.mrf.mxu3  ;;  %1433 = vmatmul.f32.gmra.mxu1 %v4186_v16 }
 0x1c6   : > { %v1371_v27 = vadd.f32 %v1370_v11, %v1225_v28  ;;  %1287 = vmatmul.f32.gmra.mxu0 %v4186_v16  ;;  %v3638_v8 = vadd.f32 %v1794_v22, %v1540_v15  ;;  %v4193_v28 = vld [vmem:[#allocation62_spill] sm:$0xff] }
 0x1c7   : > { %v4194_v15 = vld [vmem:[#allocation54_spill] sm:$0xff] }
 0x1c8   : > { %4188 = vst [vmem:[#allocation51_spill] sm:$0xff] %v3638_v8  ;;  %1675 = vmatmul.f32.gmra.mxu2 %v4189_v1  ;;  %v4195_v1 = vld [vmem:[#allocation66_spill] sm:$0xff] }
 0x1c9   : > { %2594 = vst [vmem:[%s3595_s24 + $0x50] sm:$0xff] %v1371_v27 }
 0x1ca   : > { %1861 = vmatmul.f32.gmra.mxu3 %v4190_v60  ;;  %v1374_v39 = vpop.f32.mrf.mxu1 }
 0x1cb   : > { %v1228_v44 = vpop.f32.mrf.mxu0  ;;  %v1548_v62 = vpop.f32.mrf.mxu2 }
 0x1cc   : > { %v1229_v36 = vadd.f32 %v1228_v44, %v4191_v57 }
 0x1cd   : > { %v1798_v49 = vpop.f32.mrf.mxu3  ;;  %1437 = vmatmul.f32.gmra.mxu1 %v4190_v60 }
 0x1ce   : > { %v1375_v46 = vadd.f32 %v1374_v39, %v1229_v36  ;;  %1291 = vmatmul.f32.gmra.mxu0 %v4190_v60  ;;  %v3646_v11 = vadd.f32 %v1798_v49, %v1548_v62  ;;  %v4198_v39 = vld [vmem:[#allocation59_spill] sm:$0xff] }
 0x1d0   : > { %4192 = vst [vmem:[#allocation52_spill] sm:$0xff] %v3646_v11  ;;  %1683 = vmatmul.f32.gmra.mxu2 %v4193_v28  ;;  %v4199_v28 = vld [vmem:[#allocation71_spill] sm:$0xff] }
 0x1d1   : > { %2596 = vst [vmem:[%s3595_s24 + $0x60] sm:$0xff] %v1375_v46  ;;  %v4197_v46 = vld [vmem:[#allocation67_spill] sm:$0xff] }
 0x1d2   : > { %1865 = vmatmul.f32.gmra.mxu3 %v4194_v15  ;;  %v1378_v27 = vpop.f32.mrf.mxu1 }
 0x1d3   : > { %v1232_v22 = vpop.f32.mrf.mxu0  ;;  %v1556_v44 = vpop.f32.mrf.mxu2 }
 0x1d4   : > { %v1233_v8 = vadd.f32 %v1232_v22, %v4195_v1 }
 0x1d5   : > { %v1802_v57 = vpop.f32.mrf.mxu3  ;;  %1441 = vmatmul.f32.gmra.mxu1 %v4194_v15 }
 0x1d6   : > { %v1379_v16 = vadd.f32 %v1378_v27, %v1233_v8  ;;  %1295 = vmatmul.f32.gmra.mxu0 %v4194_v15  ;;  %v3654_v36 = vadd.f32 %v1802_v57, %v1556_v44  ;;  %v4202_v27 = vld [vmem:[#allocation64_spill] sm:$0xff] }
 0x1d8   : > { %4196 = vst [vmem:[#allocation56_spill] sm:$0xff] %v3654_v36  ;;  %1691 = vmatmul.f32.gmra.mxu2 %v4197_v46  ;;  %v4203_v46 = vld [vmem:[#allocation76_spill] sm:$0xff] }
 0x1d9   : > { %2598 = vst [vmem:[%s3595_s24 + $0x70] sm:$0xff] %v1379_v16  ;;  %v4201_v16 = vld [vmem:[#allocation72_spill] sm:$0xff] }
 0x1da   : > { %1869 = vmatmul.f32.gmra.mxu3 %v4198_v39  ;;  %v1382_v49 = vpop.f32.mrf.mxu1 }
 0x1db   : > { %v1236_v62 = vpop.f32.mrf.mxu0  ;;  %v1564_v22 = vpop.f32.mrf.mxu2 }
 0x1dc   : > { %v1237_v11 = vadd.f32 %v1236_v62, %v4199_v28 }
 0x1dd   : > { %v1806_v1 = vpop.f32.mrf.mxu3  ;;  %1445 = vmatmul.f32.gmra.mxu1 %v4198_v39 }
 0x1de   : > { %v1383_v60 = vadd.f32 %v1382_v49, %v1237_v11  ;;  %1299 = vmatmul.f32.gmra.mxu0 %v4198_v39  ;;  %v3662_v8 = vadd.f32 %v1806_v1, %v1564_v22  ;;  %v4206_v49 = vld [vmem:[#allocation69_spill] sm:$0xff] }
 0x1e0   : > { %4200 = vst [vmem:[#allocation57_spill] sm:$0xff] %v3662_v8  ;;  %1699 = vmatmul.f32.gmra.mxu2 %v4201_v16  ;;  %v4207_v16 = vld [vmem:[#allocation81_spill] sm:$0xff] }
 0x1e1   : > { %2600 = vst [vmem:[%s3595_s24 + $0x80] sm:$0xff] %v1383_v60  ;;  %v4205_v60 = vld [vmem:[#allocation77_spill] sm:$0xff] }
 0x1e2   : > { %1873 = vmatmul.f32.gmra.mxu3 %v4202_v27  ;;  %v1386_v57 = vpop.f32.mrf.mxu1 }
 0x1e3   : > { %v1240_v44 = vpop.f32.mrf.mxu0  ;;  %v1572_v62 = vpop.f32.mrf.mxu2 }
 0x1e4   : > { %v1241_v36 = vadd.f32 %v1240_v44, %v4203_v46 }
 0x1e5   : > { %v1810_v28 = vpop.f32.mrf.mxu3  ;;  %1449 = vmatmul.f32.gmra.mxu1 %v4202_v27 }
 0x1e6   : > { %v1387_v15 = vadd.f32 %v1386_v57, %v1241_v36  ;;  %1303 = vmatmul.f32.gmra.mxu0 %v4202_v27  ;;  %v3670_v11 = vadd.f32 %v1810_v28, %v1572_v62  ;;  %v4210_v57 = vld [vmem:[#allocation74_spill] sm:$0xff] }
 0x1e8   : > { %4204 = vst [vmem:[#allocation61_spill] sm:$0xff] %v3670_v11  ;;  %1707 = vmatmul.f32.gmra.mxu2 %v4205_v60  ;;  %v4211_v60 = vld [vmem:[#allocation86_spill] sm:$0xff] }
 0x1e9   : > { %2602 = vst [vmem:[%s3595_s24 + $0x90] sm:$0xff] %v1387_v15  ;;  %v4209_v15 = vld [vmem:[#allocation82_spill] sm:$0xff] }
 0x1ea   : > { %1877 = vmatmul.f32.gmra.mxu3 %v4206_v49  ;;  %v1390_v1 = vpop.f32.mrf.mxu1 }
 0x1eb   : > { %v1244_v22 = vpop.f32.mrf.mxu0  ;;  %v1580_v44 = vpop.f32.mrf.mxu2 }
 0x1ec   : > { %v1245_v8 = vadd.f32 %v1244_v22, %v4207_v16 }
 0x1ed   : > { %v1814_v46 = vpop.f32.mrf.mxu3  ;;  %1453 = vmatmul.f32.gmra.mxu1 %v4206_v49 }
 0x1ee   : > { %v1391_v39 = vadd.f32 %v1390_v1, %v1245_v8  ;;  %1307 = vmatmul.f32.gmra.mxu0 %v4206_v49  ;;  %v3678_v36 = vadd.f32 %v1814_v46, %v1580_v44  ;;  %v4213_v1 = vld [vmem:[#allocation79_spill] sm:$0xff] }
 0x1f0   : > { %4208 = vst [vmem:[#allocation62_spill] sm:$0xff] %v3678_v36  ;;  %1715 = vmatmul.f32.gmra.mxu2 %v4209_v15 }
 0x1f1   : > { %2604 = vst [vmem:[%s3595_s24 + $0xa0] sm:$0xff] %v1391_v39  ;;  %v4212_v39 = vld [vmem:[#allocation87_spill] sm:$0xff] }
 0x1f2   : > { %1881 = vmatmul.f32.gmra.mxu3 %v4210_v57  ;;  %v1394_v28 = vpop.f32.mrf.mxu1 }
 0x1f3   : > { %v1248_v62 = vpop.f32.mrf.mxu0  ;;  %v1588_v22 = vpop.f32.mrf.mxu2 }
 0x1f4   : > { %v1249_v11 = vadd.f32 %v1248_v62, %v4211_v60 }
 0x1f5   : > { %v1818_v16 = vpop.f32.mrf.mxu3  ;;  %1457 = vmatmul.f32.gmra.mxu1 %v4210_v57 }
 0x1f6   : > { %v1395_v27 = vadd.f32 %v1394_v28, %v1249_v11  ;;  %1311 = vmatmul.f32.gmra.mxu0 %v4210_v57  ;;  %v3686_v8 = vadd.f32 %v1818_v16, %v1588_v22 }
 0x1f8   : > { %2606 = vst [vmem:[%s3595_s24 + $0xb0] sm:$0xff] %v1395_v27  ;;  %1723 = vmatmul.f32.gmra.mxu2 %v4212_v39  ;;  %v4214_v27 = vld [vmem:[#allocation84_spill] sm:$0xff] }
 0x1fa   : > { %1885 = vmatmul.f32.gmra.mxu3 %v4213_v1  ;;  %v1398_v46 = vpop.f32.mrf.mxu1 }
 0x1fb   : > { %v1252_v44 = vpop.f32.mrf.mxu0  ;;  %v1596_v62 = vpop.f32.mrf.mxu2 }
 0x1fc   : > { %v1253_v15 = vadd.f32 %v1252_v44, %v3451_v24 }
 0x1fd   : > { %v1822_v60 = vpop.f32.mrf.mxu3  ;;  %1461 = vmatmul.f32.gmra.mxu1 %v4213_v1 }
 0x1fe   : > { %v1399_v36 = vadd.f32 %v1398_v46, %v1253_v15  ;;  %1315 = vmatmul.f32.gmra.mxu0 %v4213_v1  ;;  %v3694_v11 = vadd.f32 %v1822_v60, %v1596_v62  ;;  %v4215_v15 = vld [vmem:[#allocation93_spill] sm:$0xff] }
 0x200   : > { %2608 = vst [vmem:[%s3595_s24 + $0xc0] sm:$0xff] %v1399_v36  ;;  %1731 = vmatmul.f32.gmra.mxu2 %v3455_v13 }
 0x202   : > { %1889 = vmatmul.f32.gmra.mxu3 %v4214_v27  ;;  %v1402_v22 = vpop.f32.mrf.mxu1 }
 0x203   : > { %v1256_v28 = vpop.f32.mrf.mxu0  ;;  %v1604_v24 = vpop.f32.mrf.mxu2 }
 0x204   : > { %v1257_v16 = vadd.f32 %v1256_v28, %v3469_v0 }
 0x205   : > { %v1826_v39 = vpop.f32.mrf.mxu3  ;;  %1465 = vmatmul.f32.gmra.mxu1 %v4214_v27 }
 0x206   : > { %v1403_v44 = vadd.f32 %v1402_v22, %v1257_v16  ;;  %1319 = vmatmul.f32.gmra.mxu0 %v4214_v27  ;;  %v3702_v46 = vadd.f32 %v1826_v39, %v1604_v24 }
 0x208   : > { %2610 = vst [vmem:[%s3595_s24 + $0xd0] sm:$0xff] %v1403_v44  ;;  %1739 = vmatmul.f32.gmra.mxu2 %v3473_v6 }
 0x20a   : > { %1893 = vmatmul.f32.gmra.mxu3 %v3440_v34  ;;  %v1406_v36 = vpop.f32.mrf.mxu1 }
 0x20b   : > { %v1260_v13 = vpop.f32.mrf.mxu0  ;;  %v1612_v0 = vpop.f32.mrf.mxu2 }
 0x20c   : > { %v1261_v62 = vadd.f32 %v1260_v13, %v4215_v15 }
 0x20d   : > { %v1830_v60 = vpop.f32.mrf.mxu3  ;;  %1469 = vmatmul.f32.gmra.mxu1 %v3440_v34 }
 0x20e   : > { %v1407_v28 = vadd.f32 %v1406_v36, %v1261_v62  ;;  %1323 = vmatmul.f32.gmra.mxu0 %v3440_v34  ;;  %v3710_v22 = vadd.f32 %v1830_v60, %v1612_v0 }
 0x210   : > { %2612 = vst [vmem:[%s3595_s24 + $0xe0] sm:$0xff] %v1407_v28  ;;  %1747 = vmatmul.f32.gmra.mxu2 %v3486_v53  ;;  %v4216_v28 = vld [vmem:[#allocation2_spill] sm:$0xff] }
 0x212   : > { %1897 = vmatmul.f32.gmra.mxu3 %v3460_v55  ;;  %v1410_v16 = vpop.f32.mrf.mxu1 }
 0x213   : > { %v1264_v6 = vpop.f32.mrf.mxu0  ;;  %v1620_v39 = vpop.f32.mrf.mxu2 }
 0x214   : > { %v1265_v24 = vadd.f32 %v1264_v6, %v3490_v37 }
 0x215   : > { %v1834_v44 = vpop.f32.mrf.mxu3  ;;  %1473 = vmatmul.f32.gmra.mxu1 %v3460_v55 }
 0x216   : > { %v1411_v13 = vadd.f32 %v1410_v16, %v1265_v24  ;;  %1327 = vmatmul.f32.gmra.mxu0 %v3460_v55  ;;  %v3718_v36 = vadd.f32 %v1834_v44, %v1620_v39  ;;  %v4217_v16 = vld [vmem:[#allocation4_spill] sm:$0xff] }
 0x218   : > { %2614 = vst [vmem:[%s3595_s24 + $0xf0] sm:$0xff] %v1411_v13  ;;  %2310 = vmatmul.f32.vlgmr.msra.gmra.mxu2 %v2887_v7 }
 0x21a   : > { %2456 = vmatmul.f32.vlgmr.msra.gmra.mxu3 %v2887_v7  ;;  %v1414_v15 = vpop.f32.mrf.mxu1 }
 0x21b   : > { %v1268_v53 = vpop.f32.mrf.mxu0  ;;  %v1628_v37 = vpop.f32.mrf.mxu2 }
 0x21c   : > { %v1269_v62 = vadd.f32 %v1268_v53, %v3496_v29  ;;  %v4218_v53 = vld [vmem:[#allocation3_spill] sm:$0xff] }
 0x21d   : > { %v1838_v0 = vpop.f32.mrf.mxu3  ;;  %2100 = vmatmul.f32.vlgmr.msra.gmra.mxu1 %v4217_v16  ;;  %v4220_v16 = vld [vmem:[#allocation6_spill] sm:$0xff] }
 0x21e   : > { %v1415_v60 = vadd.f32 %v1414_v15, %v1269_v62  ;;  %1921 = vmatmul.f32.vlgmr.msra.gmra.mxu0 %v4216_v28  ;;  %v3726_v6 = vadd.f32 %v1838_v0, %v1628_v37  ;;  %v4219_v62 = vld [vmem:[#allocation5_spill] sm:$0xff] }
 0x220   : > { %2616 = vst [vmem:[%s3595_s24 + $0x100] sm:$0xff] %v1415_v60  ;;  %2314 = vmatmul.f32.gmra.mxu2 %v2891_v12 }
 0x222   : > { %2460 = vmatmul.f32.gmra.mxu3 %v2891_v12  ;;  %v1418_v24 = vpop.f32.mrf.mxu1 }
 0x223   : > { %v1272_v7 = vpop.f32.mrf.mxu0  ;;  %v1636_v29 = vpop.f32.mrf.mxu2 }
 0x224   : > { %v1273_v39 = vadd.f32 %v1272_v7, %v3502_v18 }
 0x225   : > { %v1842_v44 = vpop.f32.mrf.mxu3  ;;  %2106 = vmatmul.f32.gmra.mxu1 %v4219_v62 }
 0x226   : > { %v1419_v13 = vadd.f32 %v1418_v24, %v1273_v39  ;;  %1926 = vmatmul.f32.gmra.mxu0 %v4218_v53  ;;  %v3734_v15 = vadd.f32 %v1842_v44, %v1636_v29  ;;  %v4221_v24 = vld [vmem:[#allocation7_spill] sm:$0xff]  ;;  %v4222_v53 = vld [vmem:[#allocation8_spill] sm:$0xff] }
 0x228   : > { %2618 = vst [vmem:[%s3595_s24 + $0x110] sm:$0xff] %v1419_v13  ;;  %2318 = vmatmul.f32.gmra.mxu2 %v2910_v23 }
 0x22a   : > { %2464 = vmatmul.f32.gmra.mxu3 %v2910_v23  ;;  %v1422_v37 = vpop.f32.mrf.mxu1 }
 0x22b   : > { %v1276_v12 = vpop.f32.mrf.mxu0  ;;  %v1644_v18 = vpop.f32.mrf.mxu2 }
 0x22c   : > { %v1277_v0 = vadd.f32 %v1276_v12, %v3508_v32  ;;  %v4223_v12 = vld [vmem:[#allocation9_spill] sm:$0xff] }
 0x22d   : > { %v1846_v60 = vpop.f32.mrf.mxu3  ;;  %2112 = vmatmul.f32.gmra.mxu1 %v4221_v24  ;;  %v4225_v24 = vld [vmem:[#allocation11_spill] sm:$0xff] }
 0x22e   : > { %v1423_v28 = vadd.f32 %v1422_v37, %v1277_v0  ;;  %1931 = vmatmul.f32.gmra.mxu0 %v4220_v16  ;;  %v3742_v7 = vadd.f32 %v1846_v60, %v1644_v18 }
 0x230   : > { %2620 = vst [vmem:[%s3595_s24 + $0x120] sm:$0xff] %v1423_v28  ;;  %2322 = vmatmul.f32.gmra.mxu2 %v2930_v33  ;;  %v4224_v28 = vld [vmem:[#allocation10_spill] sm:$0xff] }
 0x232   : > { %2468 = vmatmul.f32.gmra.mxu3 %v2930_v33  ;;  %v1426_v39 = vpop.f32.mrf.mxu1 }
 0x233   : > { %v1280_v23 = vpop.f32.mrf.mxu0  ;;  %v1652_v32 = vpop.f32.mrf.mxu2 }
 0x234   : > { %v1281_v29 = vadd.f32 %v1280_v23, %v3514_v50 }
 0x235   : > { %v1850_v44 = vpop.f32.mrf.mxu3  ;;  %2118 = vmatmul.f32.gmra.mxu1 %v4223_v12 }
 0x236   : > { %v1427_v13 = vadd.f32 %v1426_v39, %v1281_v29  ;;  %1936 = vmatmul.f32.gmra.mxu0 %v4222_v53  ;;  %v3750_v62 = vadd.f32 %v1850_v44, %v1652_v32  ;;  %v4226_v44 = vld [vmem:[#allocation12_spill] sm:$0xff]  ;;  %v4227_v53 = vld [vmem:[#allocation13_spill] sm:$0xff] }
 0x238   : > { %2622 = vst [vmem:[%s3595_s24 + $0x130] sm:$0xff] %v1427_v13  ;;  %2326 = vmatmul.f32.gmra.mxu2 %v2948_v40 }
 0x23a   : > { %2472 = vmatmul.f32.gmra.mxu3 %v2948_v40  ;;  %v1430_v37 = vpop.f32.mrf.mxu1 }
 0x23b   : > { %v1284_v33 = vpop.f32.mrf.mxu0  ;;  %v1660_v50 = vpop.f32.mrf.mxu2 }
 0x23c   : > { %v1285_v0 = vadd.f32 %v1284_v33, %v3520_v26 }
 0x23d   : > { %v1854_v18 = vpop.f32.mrf.mxu3  ;;  %2124 = vmatmul.f32.gmra.mxu1 %v4225_v24 }
 0x23e   : > { %v1431_v60 = vadd.f32 %v1430_v37, %v1285_v0  ;;  %1941 = vmatmul.f32.gmra.mxu0 %v4224_v28  ;;  %v3758_v16 = vadd.f32 %v1854_v18, %v1660_v50  ;;  %v4228_v50 = vld [vmem:[#allocation14_spill] sm:$0xff] }
 0x240   : > { %2624 = vst [vmem:[%s3595_s24 + $0x140] sm:$0xff] %v1431_v60  ;;  %2330 = vmatmul.f32.gmra.mxu2 %v2966_v47  ;;  %v4229_v60 = vld [vmem:[#allocation15_spill] sm:$0xff] }
 0x242   : > { %2476 = vmatmul.f32.gmra.mxu3 %v2966_v47  ;;  %v1434_v23 = vpop.f32.mrf.mxu1 }
 0x243   : > { %v1288_v40 = vpop.f32.mrf.mxu0  ;;  %v1668_v26 = vpop.f32.mrf.mxu2 }
 0x244   : > { %v1289_v39 = vadd.f32 %v1288_v40, %v3526_v31 }
 0x245   : > { %v1858_v29 = vpop.f32.mrf.mxu3  ;;  %2130 = vmatmul.f32.gmra.mxu1 %v4227_v53 }
 0x246   : > { %v1435_v32 = vadd.f32 %v1434_v23, %v1289_v39  ;;  %1946 = vmatmul.f32.gmra.mxu0 %v4226_v44  ;;  %v3766_v13 = vadd.f32 %v1858_v29, %v1668_v26  ;;  %v4230_v39 = vld [vmem:[#allocation16_spill] sm:$0xff]  ;;  %v4231_v29 = vld [vmem:[#allocation17_spill] sm:$0xff] }
 0x248   : > { %2626 = vst [vmem:[%s3595_s24 + $0x150] sm:$0xff] %v1435_v32  ;;  %2334 = vmatmul.f32.gmra.mxu2 %v2984_v54 }
 0x24a   : > { %2480 = vmatmul.f32.gmra.mxu3 %v2984_v54  ;;  %v1438_v12 = vpop.f32.mrf.mxu1 }
 0x24b   : > { %v1292_v47 = vpop.f32.mrf.mxu0  ;;  %v1676_v31 = vpop.f32.mrf.mxu2 }
 0x24c   : > { %v1293_v33 = vadd.f32 %v1292_v47, %v3532_v38 }
 0x24d   : > { %v1862_v37 = vpop.f32.mrf.mxu3  ;;  %2136 = vmatmul.f32.gmra.mxu1 %v4229_v60 }
 0x24e   : > { %v1439_v0 = vadd.f32 %v1438_v12, %v1293_v33  ;;  %1951 = vmatmul.f32.gmra.mxu0 %v4228_v50  ;;  %v3774_v18 = vadd.f32 %v1862_v37, %v1676_v31  ;;  %v4232_v12 = vld [vmem:[#allocation18_spill] sm:$0xff]  ;;  %v4233_v31 = vld [vmem:[#allocation19_spill] sm:$0xff] }
 0x250   : > { %2628 = vst [vmem:[%s3595_s24 + $0x160] sm:$0xff] %v1439_v0  ;;  %2338 = vmatmul.f32.gmra.mxu2 %v3002_v61 }
 0x252   : > { %2484 = vmatmul.f32.gmra.mxu3 %v3002_v61  ;;  %v1442_v28 = vpop.f32.mrf.mxu1 }
 0x253   : > { %v1296_v54 = vpop.f32.mrf.mxu0  ;;  %v1684_v38 = vpop.f32.mrf.mxu2 }
 0x254   : > { %v1297_v24 = vadd.f32 %v1296_v54, %v3538_v45  ;;  %v4234_v54 = vld [vmem:[#allocation20_spill] sm:$0xff] }
 0x255   : > { %v1866_v40 = vpop.f32.mrf.mxu3  ;;  %2142 = vmatmul.f32.gmra.mxu1 %v4231_v29  ;;  %v4236_v29 = vld [vmem:[#allocation22_spill] sm:$0xff] }
 0x256   : > { %v1443_v23 = vadd.f32 %v1442_v28, %v1297_v24  ;;  %1956 = vmatmul.f32.gmra.mxu0 %v4230_v39  ;;  %v3782_v26 = vadd.f32 %v1866_v40, %v1684_v38  ;;  %v4235_v24 = vld [vmem:[#allocation21_spill] sm:$0xff] }
 0x258   : > { %2630 = vst [vmem:[%s3595_s24 + $0x170] sm:$0xff] %v1443_v23  ;;  %2342 = vmatmul.f32.gmra.mxu2 %v3020_v4 }
 0x25a   : > { %2488 = vmatmul.f32.gmra.mxu3 %v3020_v4  ;;  %v1446_v32 = vpop.f32.mrf.mxu1 }
 0x25b   : > { %v1300_v61 = vpop.f32.mrf.mxu0  ;;  %v1692_v45 = vpop.f32.mrf.mxu2 }
 0x25c   : > { %v1301_v44 = vadd.f32 %v1300_v61, %v3544_v52 }
 0x25d   : > { %v1870_v53 = vpop.f32.mrf.mxu3  ;;  %2148 = vmatmul.f32.gmra.mxu1 %v4233_v31 }
 0x25e   : > { %v1447_v47 = vadd.f32 %v1446_v32, %v1301_v44  ;;  %1961 = vmatmul.f32.gmra.mxu0 %v4232_v12  ;;  %v3790_v33 = vadd.f32 %v1870_v53, %v1692_v45  ;;  %v4237_v32 = vld [vmem:[#allocation23_spill] sm:$0xff]  ;;  %v4238_v12 = vld [vmem:[#allocation24_spill] sm:$0xff] }
 0x260   : > { %2632 = vst [vmem:[%s3595_s24 + $0x180] sm:$0xff] %v1447_v47  ;;  %2346 = vmatmul.f32.gmra.mxu2 %v3038_v14 }
 0x262   : > { %2492 = vmatmul.f32.gmra.mxu3 %v3038_v14  ;;  %v1450_v37 = vpop.f32.mrf.mxu1 }
 0x263   : > { %v1304_v4 = vpop.f32.mrf.mxu0  ;;  %v1700_v52 = vpop.f32.mrf.mxu2 }
 0x264   : > { %v1305_v0 = vadd.f32 %v1304_v4, %v3550_v59  ;;  %v4239_v4 = vld [vmem:[#allocation25_spill] sm:$0xff] }
 0x265   : > { %v1874_v50 = vpop.f32.mrf.mxu3  ;;  %2154 = vmatmul.f32.gmra.mxu1 %v4235_v24  ;;  %v4241_v24 = vld [vmem:[#allocation27_spill] sm:$0xff] }
 0x266   : > { %v1451_v60 = vadd.f32 %v1450_v37, %v1305_v0  ;;  %1966 = vmatmul.f32.gmra.mxu0 %v4234_v54  ;;  %v3798_v28 = vadd.f32 %v1874_v50, %v1700_v52 }
 0x268   : > { %2634 = vst [vmem:[%s3595_s24 + $0x190] sm:$0xff] %v1451_v60  ;;  %2350 = vmatmul.f32.gmra.mxu2 %v3056_v25  ;;  %v4240_v60 = vld [vmem:[#allocation26_spill] sm:$0xff] }
 0x26a   : > { %2496 = vmatmul.f32.gmra.mxu3 %v3056_v25  ;;  %v1454_v38 = vpop.f32.mrf.mxu1 }
 0x26b   : > { %v1308_v14 = vpop.f32.mrf.mxu0  ;;  %v1708_v59 = vpop.f32.mrf.mxu2 }
 0x26c   : > { %v1309_v40 = vadd.f32 %v1308_v14, %v3556_v2 }
 0x26d   : > { %v1878_v23 = vpop.f32.mrf.mxu3  ;;  %2160 = vmatmul.f32.gmra.mxu1 %v4237_v32 }
 0x26e   : > { %v1455_v39 = vadd.f32 %v1454_v38, %v1309_v40  ;;  %1971 = vmatmul.f32.gmra.mxu0 %v4236_v29  ;;  %v3806_v61 = vadd.f32 %v1878_v23, %v1708_v59  ;;  %v4242_v23 = vld [vmem:[#allocation28_spill] sm:$0xff]  ;;  %v4243_v29 = vld [vmem:[#allocation29_spill] sm:$0xff] }
 0x270   : > { %2636 = vst [vmem:[%s3595_s24 + $0x1a0] sm:$0xff] %v1455_v39  ;;  %2354 = vmatmul.f32.gmra.mxu2 %v3074_v41 }
 0x272   : > { %2500 = vmatmul.f32.gmra.mxu3 %v3074_v41  ;;  %v1458_v44 = vpop.f32.mrf.mxu1 }
 0x273   : > { %v1312_v25 = vpop.f32.mrf.mxu0  ;;  %v1716_v2 = vpop.f32.mrf.mxu2 }
 0x274   : > { %v1313_v45 = vadd.f32 %v1312_v25, %v3562_v10 }
 0x275   : > { %v1882_v53 = vpop.f32.mrf.mxu3  ;;  %2166 = vmatmul.f32.gmra.mxu1 %v4239_v4 }
 0x276   : > { %v1459_v47 = vadd.f32 %v1458_v44, %v1313_v45  ;;  %1976 = vmatmul.f32.gmra.mxu0 %v4238_v12  ;;  %v3814_v31 = vadd.f32 %v1882_v53, %v1716_v2  ;;  %v4244_v2 = vld [vmem:[#allocation30_spill] sm:$0xff] }
 0x278   : > { %2638 = vst [vmem:[%s3595_s24 + $0x1b0] sm:$0xff] %v1459_v47  ;;  %2358 = vmatmul.f32.gmra.mxu2 %v3092_v56  ;;  %v4245_v47 = vld [vmem:[#allocation31_spill] sm:$0xff] }
 0x27a   : > { %2504 = vmatmul.f32.gmra.mxu3 %v3092_v56  ;;  %v1462_v37 = vpop.f32.mrf.mxu1 }
 0x27b   : > { %v1316_v41 = vpop.f32.mrf.mxu0  ;;  %v1724_v10 = vpop.f32.mrf.mxu2 }
 0x27c   : > { %v1317_v0 = vadd.f32 %v1316_v41, %v3568_v21 }
 0x27d   : > { %v1886_v52 = vpop.f32.mrf.mxu3  ;;  %2172 = vmatmul.f32.gmra.mxu1 %v4241_v24 }
 0x27e   : > { %v1463_v50 = vadd.f32 %v1462_v37, %v1317_v0  ;;  %1981 = vmatmul.f32.gmra.mxu0 %v4240_v60  ;;  %v3822_v54 = vadd.f32 %v1886_v52, %v1724_v10  ;;  %v4246_v0 = vld [vmem:[#allocation32_spill] sm:$0xff]  ;;  %v4247_v52 = vld [vmem:[#allocation33_spill] sm:$0xff] }
 0x280   : > { %2640 = vst [vmem:[%s3595_s24 + $0x1c0] sm:$0xff] %v1463_v50  ;;  %2362 = vmatmul.f32.gmra.mxu2 %v3110_v9 }
 0x282   : > { %2508 = vmatmul.f32.gmra.mxu3 %v3110_v9  ;;  %v1466_v14 = vpop.f32.mrf.mxu1 }
 0x283   : > { %v1320_v56 = vpop.f32.mrf.mxu0  ;;  %v1732_v21 = vpop.f32.mrf.mxu2 }
 0x284   : > { %v1321_v38 = vadd.f32 %v1320_v56, %v3574_v35 }
 0x285   : > { %v1890_v40 = vpop.f32.mrf.mxu3  ;;  %2178 = vmatmul.f32.gmra.mxu1 %v4243_v29 }
 0x286   : > { %v1467_v59 = vadd.f32 %v1466_v14, %v1321_v38  ;;  %1986 = vmatmul.f32.gmra.mxu0 %v4242_v23  ;;  %v3830_v39 = vadd.f32 %v1890_v40, %v1732_v21  ;;  %v4248_v14 = vld [vmem:[#allocation34_spill] sm:$0xff]  ;;  %v4249_v38 = vld [vmem:[#allocation35_spill] sm:$0xff] }
 0x288   : > { %2642 = vst [vmem:[%s3595_s24 + $0x1d0] sm:$0xff] %v1467_v59  ;;  %2366 = vmatmul.f32.gmra.mxu2 %v3128_v42 }
 0x28a   : > { %2512 = vmatmul.f32.gmra.mxu3 %v3128_v42  ;;  %v1470_v32 = vpop.f32.mrf.mxu1 }
 0x28b   : > { %v1324_v9 = vpop.f32.mrf.mxu0  ;;  %v1740_v35 = vpop.f32.mrf.mxu2 }
 0x28c   : > { %v1325_v25 = vadd.f32 %v1324_v9, %v3580_v51 }
 0x28d   : > { %v1894_v44 = vpop.f32.mrf.mxu3  ;;  %2184 = vmatmul.f32.gmra.mxu1 %v4245_v47 }
 0x28e   : > { %v1471_v45 = vadd.f32 %v1470_v32, %v1325_v25  ;;  %1991 = vmatmul.f32.gmra.mxu0 %v4244_v2  ;;  %v3838_v53 = vadd.f32 %v1894_v44, %v1740_v35  ;;  %v4250_v32 = vld [vmem:[#allocation36_spill] sm:$0xff]  ;;  %v4251_v25 = vld [vmem:[#allocation37_spill] sm:$0xff] }
 0x290   : > { %2644 = vst [vmem:[%s3595_s24 + $0x1e0] sm:$0xff] %v1471_v45  ;;  %2370 = vmatmul.f32.gmra.mxu2 %v3146_v17 }
 0x292   : > { %2516 = vmatmul.f32.gmra.mxu3 %v3146_v17  ;;  %v1474_v12 = vpop.f32.mrf.mxu1 }
 0x293   : > { %v1328_v42 = vpop.f32.mrf.mxu0  ;;  %v1748_v51 = vpop.f32.mrf.mxu2 }
 0x294   : > { %v1329_v4 = vadd.f32 %v1328_v42, %v3586_v5 }
 0x295   : > { %v1898_v41 = vpop.f32.mrf.mxu3  ;;  %2190 = vmatmul.f32.gmra.mxu1 %v4247_v52 }
 0x296   : > { %v1475_v37 = vadd.f32 %v1474_v12, %v1329_v4  ;;  %1996 = vmatmul.f32.gmra.mxu0 %v4246_v0  ;;  %v3846_v10 = vadd.f32 %v1898_v41, %v1748_v51  ;;  %v4252_v12 = vld [vmem:[#allocation38_spill] sm:$0xff]  ;;  %v4253_v4 = vld [vmem:[#allocation39_spill] sm:$0xff] }
 0x298   : > { %2646 = vst [vmem:[%s3595_s24 + $0x1f0] sm:$0xff] %v1475_v37  ;;  %2374 = vmatmul.f32.gmra.mxu2 %v3164_v63 }
 0x29a   : > { %2520 = vmatmul.f32.gmra.mxu3 %v3164_v63  ;;  %v2101_v50 = vpop.f32.mrf.mxu1 }
 0x29b   : > { %v1922_v17 = vpop.f32.mrf.mxu0  ;;  %v2311_v5 = vpop.f32.mrf.mxu2 }
 0x29c   : > { %v1923_v60 = vadd.f32 %v1922_v17, %v3598_v20 }
 0x29d   : > { %v2457_v24 = vpop.f32.mrf.mxu3  ;;  %2196 = vmatmul.f32.gmra.mxu1 %v4249_v38  ;;  %v4257_v38 = vld [vmem:[#allocation47_spill] sm:$0xff] }
 0x29e   : > { %v2102_v56 = vadd.f32 %v2101_v50, %v1923_v60  ;;  %2001 = vmatmul.f32.gmra.mxu0 %v4248_v14  ;;  %v4254_v50 = vld [vmem:[#allocation40_spill] sm:$0xff]  ;;  %v4255_v60 = vld [vmem:[#allocation41_spill] sm:$0xff] }
 0x2a0   : > { %v2312_v21 = vadd.f32 %v2311_v5, %v2102_v56  ;;  %2378 = vmatmul.f32.gmra.mxu2 %v3182_v48 }
 0x2a2   : > { %v2458_v40 = vadd.f32 %v2457_v24, %v2312_v21  ;;  %2524 = vmatmul.f32.gmra.mxu3 %v3182_v48  ;;  %v2107_v63 = vpop.f32.mrf.mxu1  ;;  %v4256_v24 = vld [vmem:[#allocation42_spill] sm:$0xff] }
 0x2a3   : > { %v1927_v59 = vpop.f32.mrf.mxu0  ;;  %v2315_v20 = vpop.f32.mrf.mxu2 }
 0x2a4   : > { %2585 = vst [vmem:[%s3595_s24 + $0x8] sm:$0xff] %v2458_v40  ;;  %v1928_v23 = vadd.f32 %v1927_v59, %v3606_v3 }
 0x2a5   : > { %v2461_v29 = vpop.f32.mrf.mxu3  ;;  %2202 = vmatmul.f32.gmra.mxu1 %v4251_v25 }
 0x2a6   : > { %v2108_v9 = vadd.f32 %v2107_v63, %v1928_v23  ;;  %2006 = vmatmul.f32.gmra.mxu0 %v4250_v32  ;;  %v4258_v63 = vld [vmem:[#allocation43_spill] sm:$0xff]  ;;  %v4259_v23 = vld [vmem:[#allocation44_spill] sm:$0xff] }
 0x2a8   : > { %v2316_v35 = vadd.f32 %v2315_v20, %v2108_v9  ;;  %2382 = vmatmul.f32.gmra.mxu2 %v3200_v30 }
 0x2aa   : > { %v2462_v44 = vadd.f32 %v2461_v29, %v2316_v35  ;;  %2528 = vmatmul.f32.gmra.mxu3 %v3200_v30  ;;  %v2113_v45 = vpop.f32.mrf.mxu1  ;;  %v4260_v29 = vld [vmem:[#allocation45_spill] sm:$0xff]  ;;  %v4261_v35 = vld [vmem:[#allocation51_spill] sm:$0xff] }
 0x2ab   : > { %v1932_v48 = vpop.f32.mrf.mxu0  ;;  %v2319_v3 = vpop.f32.mrf.mxu2 }
 0x2ac   : > { %2587 = vst [vmem:[%s3595_s24 + $0x18] sm:$0xff] %v2462_v44  ;;  %v1933_v2 = vadd.f32 %v1932_v48, %v3614_v58 }
 0x2ad   : > { %v2465_v47 = vpop.f32.mrf.mxu3  ;;  %2208 = vmatmul.f32.gmra.mxu1 %v4253_v4 }
 0x2ae   : > { %v2114_v42 = vadd.f32 %v2113_v45, %v1933_v2  ;;  %2011 = vmatmul.f32.gmra.mxu0 %v4252_v12  ;;  %v4264_v12 = vld [vmem:[#allocation49_spill] sm:$0xff] }
 0x2b0   : > { %v2320_v51 = vadd.f32 %v2319_v3, %v2114_v42  ;;  %2386 = vmatmul.f32.gmra.mxu2 %v3220_v19  ;;  %v4262_v3 = vld [vmem:[#allocation46_spill] sm:$0xff] }
 0x2b2   : > { %v2466_v41 = vadd.f32 %v2465_v47, %v2320_v51  ;;  %2532 = vmatmul.f32.gmra.mxu3 %v3220_v19  ;;  %v2119_v37 = vpop.f32.mrf.mxu1  ;;  %v4263_v47 = vld [vmem:[#allocation48_spill] sm:$0xff] }
 0x2b3   : > { %v1937_v30 = vpop.f32.mrf.mxu0  ;;  %v2323_v58 = vpop.f32.mrf.mxu2 }
 0x2b4   : > { %2589 = vst [vmem:[%s3595_s24 + $0x28] sm:$0xff] %v2466_v41  ;;  %v1938_v0 = vadd.f32 %v1937_v30, %v3622_v43  ;;  %v4265_v30 = vld [vmem:[#allocation52_spill] sm:$0xff] }
 0x2b5   : > { %v2469_v52 = vpop.f32.mrf.mxu3  ;;  %2214 = vmatmul.f32.gmra.mxu1 %v4255_v60 }
 0x2b6   : > { %v2120_v17 = vadd.f32 %v2119_v37, %v1938_v0  ;;  %2016 = vmatmul.f32.gmra.mxu0 %v4254_v50  ;;  %v4267_v50 = vld [vmem:[#allocation53_spill] sm:$0xff] }
 0x2b8   : > { %v2324_v5 = vadd.f32 %v2323_v58, %v2120_v17  ;;  %2390 = vmatmul.f32.gmra.mxu2 %v4256_v24  ;;  %v4266_v17 = vld [vmem:[#allocation50_spill] sm:$0xff] }
 0x2ba   : > { %v2470_v56 = vadd.f32 %v2469_v52, %v2324_v5  ;;  %2536 = vmatmul.f32.gmra.mxu3 %v4256_v24  ;;  %v2125_v14 = vpop.f32.mrf.mxu1  ;;  %v4268_v5 = vld [vmem:[#allocation54_spill] sm:$0xff] }
 0x2bb   : > { %v1942_v19 = vpop.f32.mrf.mxu0  ;;  %v2327_v43 = vpop.f32.mrf.mxu2 }
 0x2bc   : > { %2591 = vst [vmem:[%s3595_s24 + $0x38] sm:$0xff] %v2470_v56  ;;  %v1943_v21 = vadd.f32 %v1942_v19, %v4257_v38 }
 0x2bd   : > { %v2473_v40 = vpop.f32.mrf.mxu3  ;;  %2220 = vmatmul.f32.gmra.mxu1 %v4259_v23 }
 0x2be   : > { %v2126_v59 = vadd.f32 %v2125_v14, %v1943_v21  ;;  %2021 = vmatmul.f32.gmra.mxu0 %v4258_v63  ;;  %v4269_v14 = vld [vmem:[#allocation56_spill] sm:$0xff]  ;;  %v4271_v63 = vld [vmem:[#allocation58_spill] sm:$0xff] }
 0x2c0   : > { %v2328_v20 = vadd.f32 %v2327_v43, %v2126_v59  ;;  %2394 = vmatmul.f32.gmra.mxu2 %v4260_v29  ;;  %v4270_v59 = vld [vmem:[#allocation55_spill] sm:$0xff] }
 0x2c2   : > { %v2474_v9 = vadd.f32 %v2473_v40, %v2328_v20  ;;  %2540 = vmatmul.f32.gmra.mxu3 %v4260_v29  ;;  %v2131_v25 = vpop.f32.mrf.mxu1  ;;  %v4272_v20 = vld [vmem:[#allocation59_spill] sm:$0xff] }
 0x2c3   : > { %v1947_v32 = vpop.f32.mrf.mxu0  ;;  %v2331_v48 = vpop.f32.mrf.mxu2 }
 0x2c4   : > { %2593 = vst [vmem:[%s3595_s24 + $0x48] sm:$0xff] %v2474_v9  ;;  %v1948_v44 = vadd.f32 %v1947_v32, %v4261_v35 }
 0x2c5   : > { %v2477_v45 = vpop.f32.mrf.mxu3  ;;  %2226 = vmatmul.f32.gmra.mxu1 %v4263_v47 }
 0x2c6   : > { %v2132_v2 = vadd.f32 %v2131_v25, %v1948_v44  ;;  %2026 = vmatmul.f32.gmra.mxu0 %v4262_v3  ;;  %v4273_v25 = vld [vmem:[#allocation57_spill] sm:$0xff]  ;;  %v4275_v3 = vld [vmem:[#allocation63_spill] sm:$0xff] }
 0x2c8   : > { %v2332_v42 = vadd.f32 %v2331_v48, %v2132_v2  ;;  %2398 = vmatmul.f32.gmra.mxu2 %v4264_v12  ;;  %v4274_v2 = vld [vmem:[#allocation60_spill] sm:$0xff] }
 0x2ca   : > { %v2478_v4 = vadd.f32 %v2477_v45, %v2332_v42  ;;  %2544 = vmatmul.f32.gmra.mxu3 %v4264_v12  ;;  %v2137_v41 = vpop.f32.mrf.mxu1  ;;  %v4276_v42 = vld [vmem:[#allocation64_spill] sm:$0xff] }
 0x2cb   : > { %v1952_v51 = vpop.f32.mrf.mxu0  ;;  %v2335_v0 = vpop.f32.mrf.mxu2 }
 0x2cc   : > { %2595 = vst [vmem:[%s3595_s24 + $0x58] sm:$0xff] %v2478_v4  ;;  %v1953_v37 = vadd.f32 %v1952_v51, %v4265_v30 }
 0x2cd   : > { %v2481_v58 = vpop.f32.mrf.mxu3  ;;  %2232 = vmatmul.f32.gmra.mxu1 %v4267_v50 }
 0x2ce   : > { %v2138_v52 = vadd.f32 %v2137_v41, %v1953_v37  ;;  %2031 = vmatmul.f32.gmra.mxu0 %v4266_v17  ;;  %v4277_v41 = vld [vmem:[#allocation61_spill] sm:$0xff]  ;;  %v4279_v17 = vld [vmem:[#allocation68_spill] sm:$0xff] }
 0x2d0   : > { %v2336_v60 = vadd.f32 %v2335_v0, %v2138_v52  ;;  %2402 = vmatmul.f32.gmra.mxu2 %v4268_v5  ;;  %v4278_v52 = vld [vmem:[#allocation65_spill] sm:$0xff] }
 0x2d2   : > { %v2482_v24 = vadd.f32 %v2481_v58, %v2336_v60  ;;  %2548 = vmatmul.f32.gmra.mxu3 %v4268_v5  ;;  %v2143_v19 = vpop.f32.mrf.mxu1 }
 0x2d3   : > { %v1957_v56 = vpop.f32.mrf.mxu0  ;;  %v2339_v21 = vpop.f32.mrf.mxu2 }
 0x2d4   : > { %2597 = vst [vmem:[%s3595_s24 + $0x68] sm:$0xff] %v2482_v24  ;;  %v1958_v38 = vadd.f32 %v1957_v56, %v4269_v14  ;;  %v4280_v56 = vld [vmem:[#allocation62_spill] sm:$0xff] }
 0x2d5   : > { %v2485_v43 = vpop.f32.mrf.mxu3  ;;  %2238 = vmatmul.f32.gmra.mxu1 %v4271_v63 }
 0x2d6   : > { %v2144_v40 = vadd.f32 %v2143_v19, %v1958_v38  ;;  %2036 = vmatmul.f32.gmra.mxu0 %v4270_v59 }
 0x2d8   : > { %v2340_v23 = vadd.f32 %v2339_v21, %v2144_v40  ;;  %2406 = vmatmul.f32.gmra.mxu2 %v4272_v20  ;;  %v4282_v40 = vld [vmem:[#allocation73_spill] sm:$0xff] }
 0x2da   : > { %v2486_v29 = vadd.f32 %v2485_v43, %v2340_v23  ;;  %2552 = vmatmul.f32.gmra.mxu3 %v4272_v20  ;;  %v2149_v32 = vpop.f32.mrf.mxu1  ;;  %v4281_v43 = vld [vmem:[#allocation70_spill] sm:$0xff] }
 0x2db   : > { %v1962_v9 = vpop.f32.mrf.mxu0  ;;  %v2343_v44 = vpop.f32.mrf.mxu2 }
 0x2dc   : > { %2599 = vst [vmem:[%s3595_s24 + $0x78] sm:$0xff] %v2486_v29  ;;  %v1963_v35 = vadd.f32 %v1962_v9, %v4273_v25  ;;  %v4283_v25 = vld [vmem:[#allocation75_spill] sm:$0xff] }
 0x2dd   : > { %v2489_v48 = vpop.f32.mrf.mxu3  ;;  %2244 = vmatmul.f32.gmra.mxu1 %v4275_v3 }
 0x2de   : > { %v2150_v45 = vadd.f32 %v2149_v32, %v1963_v35  ;;  %2041 = vmatmul.f32.gmra.mxu0 %v4274_v2  ;;  %v4284_v35 = vld [vmem:[#allocation78_spill] sm:$0xff] }
 0x2e0   : > { %v2344_v47 = vadd.f32 %v2343_v44, %v2150_v45  ;;  %2410 = vmatmul.f32.gmra.mxu2 %v4276_v42 }
 0x2e2   : > { %v2490_v12 = vadd.f32 %v2489_v48, %v2344_v47  ;;  %2556 = vmatmul.f32.gmra.mxu3 %v4276_v42  ;;  %v2155_v51 = vpop.f32.mrf.mxu1  ;;  %v4285_v42 = vld [vmem:[#allocation80_spill] sm:$0xff] }
 0x2e3   : > { %v1967_v4 = vpop.f32.mrf.mxu0  ;;  %v2347_v37 = vpop.f32.mrf.mxu2 }
 0x2e4   : > { %2601 = vst [vmem:[%s3595_s24 + $0x88] sm:$0xff] %v2490_v12  ;;  %v1968_v30 = vadd.f32 %v1967_v4, %v4277_v41  ;;  %v4286_v12 = vld [vmem:[#allocation83_spill] sm:$0xff] }
 0x2e5   : > { %v2493_v0 = vpop.f32.mrf.mxu3  ;;  %2250 = vmatmul.f32.gmra.mxu1 %v4279_v17 }
 0x2e6   : > { %v2156_v58 = vadd.f32 %v2155_v51, %v1968_v30  ;;  %2046 = vmatmul.f32.gmra.mxu0 %v4278_v52  ;;  %v4288_v52 = vld [vmem:[#allocation88_spill] sm:$0xff] }
 0x2e8   : > { %v2348_v50 = vadd.f32 %v2347_v37, %v2156_v58  ;;  %2414 = vmatmul.f32.gmra.mxu2 %v4206_v49  ;;  %v4287_v58 = vld [vmem:[#allocation85_spill] sm:$0xff] }
 0x2ea   : > { %v2494_v60 = vadd.f32 %v2493_v0, %v2348_v50  ;;  %2560 = vmatmul.f32.gmra.mxu3 %v4206_v49  ;;  %v2161_v24 = vpop.f32.mrf.mxu1 }
 0x2eb   : > { %v1972_v5 = vpop.f32.mrf.mxu0  ;;  %v2351_v14 = vpop.f32.mrf.mxu2 }
 0x2ec   : > { %2603 = vst [vmem:[%s3595_s24 + $0x98] sm:$0xff] %v2494_v60  ;;  %v1973_v19 = vadd.f32 %v1972_v5, %v4280_v56 }
 0x2ed   : > { %v2497_v38 = vpop.f32.mrf.mxu3  ;;  %2256 = vmatmul.f32.gmra.mxu1 %v4282_v40 }
 0x2ee   : > { %v2162_v21 = vadd.f32 %v2161_v24, %v1973_v19  ;;  %2051 = vmatmul.f32.gmra.mxu0 %v4281_v43  ;;  %v4289_v19 = vld [vmem:[#allocation89_spill] sm:$0xff] }
 0x2f0   : > { %v2352_v59 = vadd.f32 %v2351_v14, %v2162_v21  ;;  %2418 = vmatmul.f32.gmra.mxu2 %v4210_v57  ;;  %v4290_v14 = vld [vmem:[#allocation90_spill] sm:$0xff] }
 0x2f2   : > { %v2498_v63 = vadd.f32 %v2497_v38, %v2352_v59  ;;  %2564 = vmatmul.f32.gmra.mxu3 %v4210_v57  ;;  %v2167_v23 = vpop.f32.mrf.mxu1 }
 0x2f3   : > { %v1977_v49 = vpop.f32.mrf.mxu0  ;;  %v2355_v29 = vpop.f32.mrf.mxu2 }
 0x2f4   : > { %2605 = vst [vmem:[%s3595_s24 + $0xa8] sm:$0xff] %v2498_v63  ;;  %v1978_v20 = vadd.f32 %v1977_v49, %v3686_v8  ;;  %v4291_v49 = vld [vmem:[#allocation91_spill] sm:$0xff] }
 0x2f5   : > { %v2501_v9 = vpop.f32.mrf.mxu3  ;;  %2262 = vmatmul.f32.gmra.mxu1 %v4284_v35 }
 0x2f6   : > { %v2168_v32 = vadd.f32 %v2167_v23, %v1978_v20  ;;  %2056 = vmatmul.f32.gmra.mxu0 %v4283_v25  ;;  %v4292_v23 = vld [vmem:[#allocation92_spill] sm:$0xff] }
 0x2f8   : > { %v2356_v44 = vadd.f32 %v2355_v29, %v2168_v32  ;;  %2422 = vmatmul.f32.gmra.mxu2 %v4213_v1 }
 0x2fa   : > { %v2502_v48 = vadd.f32 %v2501_v9, %v2356_v44  ;;  %2568 = vmatmul.f32.gmra.mxu3 %v4213_v1  ;;  %v2173_v45 = vpop.f32.mrf.mxu1 }
 0x2fb   : > { %v1982_v57 = vpop.f32.mrf.mxu0  ;;  %v2359_v8 = vpop.f32.mrf.mxu2 }
 0x2fc   : > { %2607 = vst [vmem:[%s3595_s24 + $0xb8] sm:$0xff] %v2502_v48  ;;  %v1983_v2 = vadd.f32 %v1982_v57, %v3694_v11 }
 0x2fd   : > { %v2505_v3 = vpop.f32.mrf.mxu3  ;;  %2268 = vmatmul.f32.gmra.mxu1 %v4286_v12 }
 0x2fe   : > { %v2174_v47 = vadd.f32 %v2173_v45, %v1983_v2  ;;  %2061 = vmatmul.f32.gmra.mxu0 %v4285_v42 }
 0x300   : > { %v2360_v4 = vadd.f32 %v2359_v8, %v2174_v47  ;;  %2426 = vmatmul.f32.gmra.mxu2 %v4214_v27 }
 0x302   : > { %v2506_v51 = vadd.f32 %v2505_v3, %v2360_v4  ;;  %2572 = vmatmul.f32.gmra.mxu3 %v4214_v27  ;;  %v2179_v41 = vpop.f32.mrf.mxu1 }
 0x303   : > { %v1987_v1 = vpop.f32.mrf.mxu0  ;;  %v2363_v11 = vpop.f32.mrf.mxu2 }
 0x304   : > { %2609 = vst [vmem:[%s3595_s24 + $0xc8] sm:$0xff] %v2506_v51  ;;  %v1988_v30 = vadd.f32 %v1987_v1, %v3702_v46 }
 0x305   : > { %v2509_v37 = vpop.f32.mrf.mxu3  ;;  %2274 = vmatmul.f32.gmra.mxu1 %v4288_v52 }
 0x306   : > { %v2180_v0 = vadd.f32 %v2179_v41, %v1988_v30  ;;  %2066 = vmatmul.f32.gmra.mxu0 %v4287_v58 }
 0x308   : > { %v2364_v17 = vadd.f32 %v2363_v11, %v2180_v0  ;;  %2430 = vmatmul.f32.gmra.mxu2 %v3440_v34 }
 0x30a   : > { %v2510_v50 = vadd.f32 %v2509_v37, %v2364_v17  ;;  %2576 = vmatmul.f32.gmra.mxu3 %v3440_v34  ;;  %v2185_v60 = vpop.f32.mrf.mxu1 }
 0x30b   : > { %v1992_v27 = vpop.f32.mrf.mxu0  ;;  %v2367_v46 = vpop.f32.mrf.mxu2 }
 0x30c   : > { %2611 = vst [vmem:[%s3595_s24 + $0xd8] sm:$0xff] %v2510_v50  ;;  %v1993_v5 = vadd.f32 %v1992_v27, %v3710_v22 }
 0x30d   : > { %v2513_v24 = vpop.f32.mrf.mxu3  ;;  %2280 = vmatmul.f32.gmra.mxu1 %v4290_v14 }
 0x30e   : > { %v2186_v56 = vadd.f32 %v2185_v60, %v1993_v5  ;;  %2071 = vmatmul.f32.gmra.mxu0 %v4289_v19 }
 0x310   : > { %v2368_v38 = vadd.f32 %v2367_v46, %v2186_v56  ;;  %2434 = vmatmul.f32.gmra.mxu2 %v3460_v55 }
 0x312   : > { %v2514_v21 = vadd.f32 %v2513_v24, %v2368_v38  ;;  %2580 = vmatmul.f32.gmra.mxu3 %v3460_v55  ;;  %v2191_v43 = vpop.f32.mrf.mxu1 }
 0x313   : > { %v1997_v34 = vpop.f32.mrf.mxu0  ;;  %v2371_v22 = vpop.f32.mrf.mxu2 }
 0x314   : > { %2613 = vst [vmem:[%s3595_s24 + $0xe8] sm:$0xff] %v2514_v21  ;;  %v1998_v40 = vadd.f32 %v1997_v34, %v3718_v36 }
 0x315   : > { %v2517_v59 = vpop.f32.mrf.mxu3  ;;  %2286 = vmatmul.f32.gmra.mxu1 %v4292_v23 }
 0x316   : > { %v2192_v63 = vadd.f32 %v2191_v43, %v1998_v40  ;;  %2076 = vmatmul.f32.gmra.mxu0 %v4291_v49 }
 0x318   : > { %v2372_v20 = vadd.f32 %v2371_v22, %v2192_v63 }
 0x31a   : > { %v2518_v29 = vadd.f32 %v2517_v59, %v2372_v20  ;;  %v2197_v32 = vpop.f32.mrf.mxu1 }
 0x31b   : > { %v2002_v9 = vpop.f32.mrf.mxu0  ;;  %v2375_v25 = vpop.f32.mrf.mxu2 }
 0x31c   : > { %2615 = vst [vmem:[%s3595_s24 + $0xf8] sm:$0xff] %v2518_v29  ;;  %v2003_v55 = vadd.f32 %v2002_v9, %v3726_v6 }
 0x31d   : > { %v2521_v35 = vpop.f32.mrf.mxu3 }
 0x31e   : > { %v2198_v44 = vadd.f32 %v2197_v32, %v2003_v55 }
 0x320   : > { %v2376_v36 = vadd.f32 %v2375_v25, %v2198_v44 }
 0x322   : > { %v2522_v48 = vadd.f32 %v2521_v35, %v2376_v36  ;;  %v2203_v45 = vpop.f32.mrf.mxu1 }
 0x323   : > { %v2007_v57 = vpop.f32.mrf.mxu0  ;;  %v2379_v8 = vpop.f32.mrf.mxu2 }
 0x324   : > { %2617 = vst [vmem:[%s3595_s24 + $0x108] sm:$0xff] %v2522_v48  ;;  %v2008_v2 = vadd.f32 %v2007_v57, %v3734_v15 }
 0x325   : > { %v2525_v3 = vpop.f32.mrf.mxu3 }
 0x326   : > { %v2204_v47 = vadd.f32 %v2203_v45, %v2008_v2 }
 0x328   : > { %v2380_v42 = vadd.f32 %v2379_v8, %v2204_v47 }
 0x32a   : > { %v2526_v12 = vadd.f32 %v2525_v3, %v2380_v42  ;;  %v2209_v51 = vpop.f32.mrf.mxu1 }
 0x32b   : > { %v2012_v4 = vpop.f32.mrf.mxu0  ;;  %v2383_v1 = vpop.f32.mrf.mxu2 }
 0x32c   : > { %2619 = vst [vmem:[%s3595_s24 + $0x118] sm:$0xff] %v2526_v12  ;;  %v2013_v6 = vadd.f32 %v2012_v4, %v3742_v7 }
 0x32d   : > { %v2529_v41 = vpop.f32.mrf.mxu3 }
 0x32e   : > { %v2210_v30 = vadd.f32 %v2209_v51, %v2013_v6 }
 0x330   : > { %v2384_v11 = vadd.f32 %v2383_v1, %v2210_v30 }
 0x332   : > { %v2530_v37 = vadd.f32 %v2529_v41, %v2384_v11  ;;  %v2215_v58 = vpop.f32.mrf.mxu1 }
 0x333   : > { %v2017_v0 = vpop.f32.mrf.mxu0  ;;  %v2387_v52 = vpop.f32.mrf.mxu2 }
 0x334   : > { %2621 = vst [vmem:[%s3595_s24 + $0x128] sm:$0xff] %v2530_v37  ;;  %v2018_v15 = vadd.f32 %v2017_v0, %v3750_v62 }
 0x335   : > { %v2533_v17 = vpop.f32.mrf.mxu3 }
 0x336   : > { %v2216_v50 = vadd.f32 %v2215_v58, %v2018_v15 }
 0x338   : > { %v2388_v27 = vadd.f32 %v2387_v52, %v2216_v50 }
 0x33a   : > { %v2534_v60 = vadd.f32 %v2533_v17, %v2388_v27  ;;  %v2221_v46 = vpop.f32.mrf.mxu1 }
 0x33b   : > { %v2022_v5 = vpop.f32.mrf.mxu0  ;;  %v2391_v24 = vpop.f32.mrf.mxu2 }
 0x33c   : > { %2623 = vst [vmem:[%s3595_s24 + $0x138] sm:$0xff] %v2534_v60  ;;  %v2023_v7 = vadd.f32 %v2022_v5, %v3758_v16 }
 0x33d   : > { %v2537_v56 = vpop.f32.mrf.mxu3 }
 0x33e   : > { %v2222_v19 = vadd.f32 %v2221_v46, %v2023_v7 }
 0x340   : > { %v2392_v14 = vadd.f32 %v2391_v24, %v2222_v19 }
 0x342   : > { %v2538_v38 = vadd.f32 %v2537_v56, %v2392_v14  ;;  %v2227_v34 = vpop.f32.mrf.mxu1 }
 0x343   : > { %v2027_v21 = vpop.f32.mrf.mxu0  ;;  %v2395_v43 = vpop.f32.mrf.mxu2 }
 0x344   : > { %2625 = vst [vmem:[%s3595_s24 + $0x148] sm:$0xff] %v2538_v38  ;;  %v2028_v62 = vadd.f32 %v2027_v21, %v3766_v13 }
 0x345   : > { %v2541_v40 = vpop.f32.mrf.mxu3 }
 0x346   : > { %v2228_v22 = vadd.f32 %v2227_v34, %v2028_v62 }
 0x348   : > { %v2396_v59 = vadd.f32 %v2395_v43, %v2228_v22 }
 0x34a   : > { %v2542_v63 = vadd.f32 %v2541_v40, %v2396_v59  ;;  %v2233_v23 = vpop.f32.mrf.mxu1 }
 0x34b   : > { %v2032_v49 = vpop.f32.mrf.mxu0  ;;  %v2399_v20 = vpop.f32.mrf.mxu2 }
 0x34c   : > { %2627 = vst [vmem:[%s3595_s24 + $0x158] sm:$0xff] %v2542_v63  ;;  %v2033_v16 = vadd.f32 %v2032_v49, %v3774_v18 }
 0x34d   : > { %v2545_v29 = vpop.f32.mrf.mxu3 }
 0x34e   : > { %v2234_v9 = vadd.f32 %v2233_v23, %v2033_v16 }
 0x350   : > { %v2400_v32 = vadd.f32 %v2399_v20, %v2234_v9 }
 0x352   : > { %v2546_v55 = vadd.f32 %v2545_v29, %v2400_v32  ;;  %v2239_v35 = vpop.f32.mrf.mxu1 }
 0x353   : > { %v2037_v25 = vpop.f32.mrf.mxu0  ;;  %v2403_v44 = vpop.f32.mrf.mxu2 }
 0x354   : > { %2629 = vst [vmem:[%s3595_s24 + $0x168] sm:$0xff] %v2546_v55  ;;  %v2038_v13 = vadd.f32 %v2037_v25, %v3782_v26 }
 0x355   : > { %v2549_v36 = vpop.f32.mrf.mxu3 }
 0x356   : > { %v2240_v48 = vadd.f32 %v2239_v35, %v2038_v13 }
 0x358   : > { %v2404_v57 = vadd.f32 %v2403_v44, %v2240_v48 }
 0x35a   : > { %v2550_v45 = vadd.f32 %v2549_v36, %v2404_v57  ;;  %v2245_v8 = vpop.f32.mrf.mxu1 }
 0x35b   : > { %v2042_v2 = vpop.f32.mrf.mxu0  ;;  %v2407_v3 = vpop.f32.mrf.mxu2 }
 0x35c   : > { %2631 = vst [vmem:[%s3595_s24 + $0x178] sm:$0xff] %v2550_v45  ;;  %v2043_v18 = vadd.f32 %v2042_v2, %v3790_v33 }
 0x35d   : > { %v2553_v47 = vpop.f32.mrf.mxu3 }
 0x35e   : > { %v2246_v42 = vadd.f32 %v2245_v8, %v2043_v18 }
 0x360   : > { %v2408_v12 = vadd.f32 %v2407_v3, %v2246_v42 }
 0x362   : > { %v2554_v4 = vadd.f32 %v2553_v47, %v2408_v12  ;;  %v2251_v6 = vpop.f32.mrf.mxu1 }
 0x363   : > { %v2047_v51 = vpop.f32.mrf.mxu0  ;;  %v2411_v1 = vpop.f32.mrf.mxu2 }
 0x364   : > { %2633 = vst [vmem:[%s3595_s24 + $0x188] sm:$0xff] %v2554_v4  ;;  %v2048_v26 = vadd.f32 %v2047_v51, %v3798_v28 }
 0x365   : > { %v2557_v41 = vpop.f32.mrf.mxu3 }
 0x366   : > { %v2252_v30 = vadd.f32 %v2251_v6, %v2048_v26 }
 0x368   : > { %v2412_v11 = vadd.f32 %v2411_v1, %v2252_v30 }
 0x36a   : > { %v2558_v37 = vadd.f32 %v2557_v41, %v2412_v11  ;;  %v2257_v58 = vpop.f32.mrf.mxu1 }
 0x36b   : > { %v2052_v0 = vpop.f32.mrf.mxu0  ;;  %v2415_v15 = vpop.f32.mrf.mxu2 }
 0x36c   : > { %2635 = vst [vmem:[%s3595_s24 + $0x198] sm:$0xff] %v2558_v37  ;;  %v2053_v33 = vadd.f32 %v2052_v0, %v3806_v61 }
 0x36d   : > { %v2561_v52 = vpop.f32.mrf.mxu3 }
 0x36e   : > { %v2258_v17 = vadd.f32 %v2257_v58, %v2053_v33 }
 0x370   : > { %v2416_v50 = vadd.f32 %v2415_v15, %v2258_v17 }
 0x372   : > { %v2562_v27 = vadd.f32 %v2561_v52, %v2416_v50  ;;  %v2263_v5 = vpop.f32.mrf.mxu1 }
 0x373   : > { %v2057_v60 = vpop.f32.mrf.mxu0  ;;  %v2419_v46 = vpop.f32.mrf.mxu2 }
 0x374   : > { %2637 = vst [vmem:[%s3595_s24 + $0x1a8] sm:$0xff] %v2562_v27  ;;  %v2058_v28 = vadd.f32 %v2057_v60, %v3814_v31 }
 0x375   : > { %v2565_v7 = vpop.f32.mrf.mxu3 }
 0x376   : > { %v2264_v24 = vadd.f32 %v2263_v5, %v2058_v28 }
 0x378   : > { %v2420_v56 = vadd.f32 %v2419_v46, %v2264_v24 }
 0x37a   : > { %v2566_v19 = vadd.f32 %v2565_v7, %v2420_v56  ;;  %v2269_v38 = vpop.f32.mrf.mxu1 }
 0x37b   : > { %v2062_v14 = vpop.f32.mrf.mxu0  ;;  %v2423_v21 = vpop.f32.mrf.mxu2 }
 0x37c   : > { %2639 = vst [vmem:[%s3595_s24 + $0x1b8] sm:$0xff] %v2566_v19  ;;  %v2063_v61 = vadd.f32 %v2062_v14, %v3822_v54 }
 0x37d   : > { %v2569_v34 = vpop.f32.mrf.mxu3 }
 0x37e   : > { %v2270_v62 = vadd.f32 %v2269_v38, %v2063_v61 }
 0x380   : > { %v2424_v43 = vadd.f32 %v2423_v21, %v2270_v62 }
 0x382   : > { %v2570_v40 = vadd.f32 %v2569_v34, %v2424_v43  ;;  %v2275_v59 = vpop.f32.mrf.mxu1 }
 0x383   : > { %v2067_v22 = vpop.f32.mrf.mxu0  ;;  %v2427_v63 = vpop.f32.mrf.mxu2 }
 0x384   : > { %2641 = vst [vmem:[%s3595_s24 + $0x1c8] sm:$0xff] %v2570_v40  ;;  %v2068_v31 = vadd.f32 %v2067_v22, %v3830_v39 }
 0x385   : > { %v2573_v49 = vpop.f32.mrf.mxu3 }
 0x386   : > { %v2276_v23 = vadd.f32 %v2275_v59, %v2068_v31 }
 0x388   : > { %v2428_v16 = vadd.f32 %v2427_v63, %v2276_v23 }
 0x38a   : > { %v2574_v20 = vadd.f32 %v2573_v49, %v2428_v16  ;;  %v2281_v9 = vpop.f32.mrf.mxu1 }
 0x38b   : > { %v2072_v29 = vpop.f32.mrf.mxu0  ;;  %v2431_v32 = vpop.f32.mrf.mxu2 }
 0x38c   : > { %2643 = vst [vmem:[%s3595_s24 + $0x1d8] sm:$0xff] %v2574_v20  ;;  %v2073_v54 = vadd.f32 %v2072_v29, %v3838_v53 }
 0x38d   : > { %v2577_v55 = vpop.f32.mrf.mxu3 }
 0x38e   : > { %v2282_v25 = vadd.f32 %v2281_v9, %v2073_v54 }
 0x390   : > { %v2432_v35 = vadd.f32 %v2431_v32, %v2282_v25 }
 0x392   : > { %v2578_v13 = vadd.f32 %v2577_v55, %v2432_v35  ;;  %v2287_v36 = vpop.f32.mrf.mxu1 }
 0x393   : > { %v2077_v44 = vpop.f32.mrf.mxu0  ;;  %v2435_v48 = vpop.f32.mrf.mxu2 }
 0x394   : > { %2645 = vst [vmem:[%s3595_s24 + $0x1e8] sm:$0xff] %v2578_v13  ;;  %v2078_v39 = vadd.f32 %v2077_v44, %v3846_v10 }
 0x395   : > { %v2581_v45 = vpop.f32.mrf.mxu3 }
 0x396   : > { %v2288_v57 = vadd.f32 %v2287_v36, %v2078_v39 }
 0x398   : > { %v2436_v2 = vadd.f32 %v2435_v48, %v2288_v57 }
 0x39a   : > { %v2582_v8 = vadd.f32 %v2581_v45, %v2436_v2 }
 0x39c   : > { %2647 = vst [vmem:[%s3595_s24 + $0x1f8] sm:$0xff] %v2582_v8 }
 0x39d PF: > { %s12_s11 = sadd.s32 1, %s2837_s11   ;;  %s4293_s9 = smov %s2833_s10 }
 0x39e   : > { %p9_p5 = scmp.ge.s32.totalorder %s12_s11, 4   ;;  %s4294_s10 = smov %s4296_s12 }
 0x3a0   :  { %11 = sbr.rel (!%p9_p5) target bundleno = 2 (0x2), region = 61 }

</bundles_post_ra>
